<compile_context>
chip_gen: v6e
topology: v6e:2x2x1
jax: 0.10.0
libtpu: 0.0.40
codegen_flags: <defaults>
</compile_context>

<pallas_src>
import functools

import jax
import jax.numpy as jnp
from jax import lax
from jax.experimental import pallas as pl
from jax.experimental.pallas import tpu as pltpu

NUM_CLASSES = 8
IGNORE_INDEX = -1
ALPHA = 0.6
GAMMA = 1e-6
_LANES = 128
_TOKENS_PER_ROW = _LANES // NUM_CLASSES   # 16 tokens per 128-lane vreg row


def _fast_recip(x):
    # EUP approx reciprocal (vrcp) + one Newton-Raphson step on the VPU:
    # ~f32 accuracy without a full-precision divide on the saturated EUP slot.
    r = pl.reciprocal(x, approx=True)
    return r * (2.0 - x * r)


def _group8_max(x, lane):
    """Exact max within aligned 8-lane groups, broadcast back to every lane.

    Direction-proof segmented butterfly: the partner masks are derived by
    rolling a (1, 128) lane iota with the same shifts as the data, so the
    result is correct regardless of pltpu.roll's rotation-direction convention.
    XLU-only data movement; never mixes values across token groups, so the
    softmax stays exact even for hugely peaked logits.
    """
    grp = lane >> 3                                     # (1, 128)
    for d in (1, 2, 4):
        for s in (d, _LANES - d):
            src_grp = pltpu.roll(lane, shift=s, axis=1) >> 3    # actual source group
            xs = pltpu.roll(x, shift=s, axis=1)                 # (r, 128)
            x = jnp.maximum(x, jnp.where(src_grp == grp, xs, -jnp.inf))
    return x


def _dsc_loss_kernel(logits_ref, labels_ref, loss_ref, mask_ref, *,
                     n_tokens, rows_total, steps_per_core, bf16_transcendentals):
    core = pl.program_id(0)    # 2-way token-range split (both TCs on v7x)
    step = pl.program_id(1)    # token-tile index within this core's range

    @pl.when(step == 0)
    def _():
        loss_ref[...] = jnp.zeros_like(loss_ref)
        mask_ref[...] = jnp.zeros_like(mask_ref)

    r = logits_ref.shape[0]
    row0 = (core * steps_per_core + step) * r        # first row of this tile

    # Skip tiles that lie entirely past the end of the token range (these only
    # appear as the clamped duplicate step of an uneven 2-way split).
    @pl.when(row0 < rows_total)
    def _():
        x = logits_ref[...].astype(jnp.float32)      # (r, 128): 16 tokens x 8 classes
        lbl = labels_ref[...]                        # (r, 16) int32

        lane = lax.broadcasted_iota(jnp.int32, (1, _LANES), 1)   # (1, 128)
        rowi = lax.broadcasted_iota(jnp.int32, (r, 1), 0)        # (r, 1)
        tok = (rowi + row0) * _TOKENS_PER_ROW + (lane >> 3)      # global token id
        in_bounds = tok < n_tokens
        # Partial-block padding may be arbitrary bits (even NaN): sanitize.
        x = jnp.where(in_bounds, x, 0.0)

        # Label broadcast across each token's 8 class lanes on the idle MXU:
        # bmat[t, 8t + c] = 1, so (r,16) @ (16,128) puts labels[token] on all 8
        # of its lanes.  Exact for small-integer labels (single nonzero term).
        tcol = lax.broadcasted_iota(jnp.int32, (_TOKENS_PER_ROW, _LANES), 1) >> 3
        trow = lax.broadcasted_iota(jnp.int32, (_TOKENS_PER_ROW, _LANES), 0)
        bmat = (tcol == trow).astype(jnp.float32)
        lblb = jnp.dot(lbl.astype(jnp.float32), bmat,
                       preferred_element_type=jnp.float32,
                       precision=lax.Precision.HIGHEST)          # (r, 128)

        valid = jnp.logical_and(lblb != float(IGNORE_INDEX), in_bounds)
        valid_f = valid.astype(jnp.float32)
        cls_f = (lane & (NUM_CLASSES - 1)).astype(jnp.float32)   # class id = lane % 8
        one_hot = (cls_f == lblb).astype(jnp.float32)            # (r, 128)

        # ---- softmax over each aligned 8-lane class group ----
        m = _group8_max(x, lane)                                 # exact per-token max
        xm = x - m
        if bf16_transcendentals:
            # v6e/v7x only: EUP bf16 path ~2x the f32 rate (NOT 1e-5 accurate).
            e = jnp.exp(xm.astype(jnp.bfloat16)).astype(jnp.float32)
        else:
            e = jnp.exp(xm)
        # 8-lane group sums (broadcast back) via a block-diagonal ones matrix.
        gi = lax.broadcasted_iota(jnp.int32, (_LANES, _LANES), 0) >> 3
        gj = lax.broadcasted_iota(jnp.int32, (_LANES, _LANES), 1) >> 3
        smat = (gi == gj).astype(jnp.float32)
        gs = jnp.dot(e, smat, preferred_element_type=jnp.float32,
                     precision=lax.Precision.HIGHEST)            # >= 1 (exact max shift)
        probs = e * _fast_recip(gs)

        # decayed = (1 - p)^alpha * p; clamp keeps log() >= 0 even if the
        # approx-reciprocal nudges p slightly above 1.  log(0) -> -inf,
        # exp(-inf) -> 0 reproduces the reference's 0**alpha = 0.
        one_minus_p = jnp.maximum(1.0 - probs, 0.0)
        if bf16_transcendentals:
            lg = jnp.log(one_minus_p.astype(jnp.bfloat16))
            decayed = jnp.exp(jnp.asarray(ALPHA, jnp.bfloat16) * lg
                              ).astype(jnp.float32) * probs
        else:
            decayed = jnp.exp(ALPHA * jnp.log(one_minus_p)) * probs

        nom = 2.0 * decayed * one_hot + GAMMA
        denom = decayed + one_hot + GAMMA
        per_elem = 1.0 - nom * _fast_recip(denom)                # (r, 128)

        # Lane-partial accumulation into the (revisited) per-core output block;
        # no per-step scalar reduction, one cheap fold in the wrapper.
        loss_ref[...] += jnp.sum(per_elem * valid_f, axis=0,
                                 keepdims=True).reshape(1, 1, _LANES)
        mask_ref[...] += jnp.sum(valid_f, axis=0,
                                 keepdims=True).reshape(1, 1, _LANES)


def dsc_loss(logits, labels, *, tile_tokens=32768, bf16_transcendentals=False):
    """logits: (N, 8) f32/bf16; labels: (N,) int. Returns scalar f32 DSC loss."""
    n, c = logits.shape
    assert c == NUM_CLASSES, "kernel specialises num_classes == 8"
    labels_i = labels.astype(jnp.int32)

    # Pad token count to a multiple of 16 so (N, 8) -> (N/16, 128) is a
    # zero-copy reshape (no transpose, no relayout).  No-op when N % 16 == 0.
    n16 = ((n + _TOKENS_PER_ROW - 1) // _TOKENS_PER_ROW) * _TOKENS_PER_ROW
    if n16 != n:
        logits = jnp.pad(logits, ((0, n16 - n), (0, 0)))
        labels_i = jnp.pad(labels_i, (0, n16 - n), constant_values=IGNORE_INDEX)
    rows = n16 // _TOKENS_PER_ROW
    logits2d = logits.reshape(rows, _LANES)              # free: same HBM bytes
    labels2d = labels_i.reshape(rows, _TOKENS_PER_ROW)

    # Rows per grid step (16 tokens/row); default 32768 tokens -> 2048 rows.
    tile_rows = min(max(tile_tokens // _TOKENS_PER_ROW, 8), ((rows + 7) // 8) * 8)
    tile_rows = max(8, (tile_rows // 8) * 8)
    steps_total = (rows + tile_rows - 1) // tile_rows
    num_splits = 2                                   # -> both TensorCores on v7x
    steps_per_core = (steps_total + num_splits - 1) // num_splits

    def in_map(cc, ii):
        # Clamp so the trailing duplicate step of an uneven split still DMAs a
        # legal block; its compute is skipped in-kernel by the row0 guard.
        return (jnp.minimum(cc * steps_per_core + ii, steps_total - 1), 0)

    kernel = functools.partial(
        _dsc_loss_kernel,
        n_tokens=n, rows_total=rows, steps_per_core=steps_per_core,
        bf16_transcendentals=bf16_transcendentals)

    loss_parts, mask_parts = pl.pallas_call(
        kernel,
        out_shape=(jax.ShapeDtypeStruct((num_splits, 1, _LANES), jnp.float32),
                   jax.ShapeDtypeStruct((num_splits, 1, _LANES), jnp.float32)),
        grid_spec=pltpu.PrefetchScalarGridSpec(
            num_scalar_prefetch=0,
            grid=(num_splits, steps_per_core),
            in_specs=[
                pl.BlockSpec((tile_rows, _LANES), in_map),
                pl.BlockSpec((tile_rows, _TOKENS_PER_ROW), in_map),
            ],
            out_specs=[
                pl.BlockSpec((1, 1, _LANES), lambda cc, ii: (cc, 0, 0)),
                pl.BlockSpec((1, 1, _LANES), lambda cc, ii: (cc, 0, 0)),
            ],
        ),
        compiler_params=pltpu.CompilerParams(
            dimension_semantics=("parallel", "arbitrary"),
            vmem_limit_bytes=48 * 1024 * 1024),
    )(logits2d, labels2d)

    loss_sum = jnp.sum(loss_parts)
    # Each valid token was counted once per class lane -> divide by 8.
    valid_cnt = jnp.sum(mask_parts) * (1.0 / NUM_CLASSES)
    # Matches the reference exactly, including NaN/Inf when every token is
    # ignored (valid_cnt == 0).
    return loss_sum / valid_cnt


def dsc_loss_ref(logits, labels):
    probs = jax.nn.softmax(logits.astype(jnp.float32), axis=-1)
    valid = labels != IGNORE_INDEX
    one_hot = jax.nn.one_hot(labels * valid, NUM_CLASSES, dtype=jnp.float32)
    decayed = (1.0 - probs) ** ALPHA * probs
    nom = 2.0 * decayed * one_hot + GAMMA
    denom = decayed + one_hot + GAMMA
    loss = jnp.sum(1.0 - nom / denom, axis=-1) * valid
    return jnp.sum(loss) / jnp.sum(valid)


if __name__ == "__main__":
    key = jax.random.PRNGKey(0)
    k1, k2 = jax.random.split(key)
    N, C = 300, NUM_CLASSES                      # N % 16 != 0: exercises the pad path
    logits = jax.random.normal(k1, (N, C), dtype=jnp.float32)
    labels = jax.random.randint(k2, (N,), 0, C, dtype=jnp.int32)
    # a few ignored positions + a hugely peaked logit (p -> 1, (1-p)**a -> 0**a)
    labels = labels.at[3].set(IGNORE_INDEX).at[101].set(IGNORE_INDEX)
    logits = logits.at[7, 2].set(1.0e4)

    ref = jax.block_until_ready(dsc_loss_ref(logits, labels))

    # small tile: multi-step grid + uneven 2-way split (clamped duplicate tile)
    out_small = jax.block_until_ready(dsc_loss(logits, labels, tile_tokens=128))
    # default big tile: one step per core
    out_default = jax.block_until_ready(dsc_loss(logits, labels))

    assert bool(jnp.isfinite(out_default)), out_default
    assert jnp.allclose(out_small, ref, rtol=1e-5, atol=1e-6), (out_small, ref)
    assert jnp.allclose(out_default, ref, rtol=1e-5, atol=1e-6), (out_default, ref)
    print("KERNEL_OK")
</pallas_src>

<mosaic_0001>
module attributes {stable_mosaic.version = 11 : i64} {
  func.func @_dsc_loss_kernel(%arg0: i32, %arg1: i32, %arg2: memref<8x128xf32, #tpu.memory_space<vmem>>, %arg3: memref<8x16xi32, #tpu.memory_space<vmem>>, %arg4: memref<1x1x128xf32, #tpu.memory_space<vmem>>, %arg5: memref<1x1x128xf32, #tpu.memory_space<vmem>>) attributes {dimension_semantics = [#tpu.dimension_semantics<parallel>, #tpu.dimension_semantics<arbitrary>], iteration_bounds = array<i64: 2, 2>, scalar_prefetch = 0 : i64, scratch_operands = 0 : i64, tpu.core_type = #tpu.core_type<tc>, window_params = [{transform_indices = @transform_0, window_bounds = array<i64: 8, 128>}, {transform_indices = @transform_1, window_bounds = array<i64: 8, 16>}, {transform_indices = @transform_2, window_bounds = array<i64: 1, 1, 128>}, {transform_indices = @transform_3, window_bounds = array<i64: 1, 1, 128>}]} {
    %c0_i32 = arith.constant 0 : i32
    %0 = arith.cmpi eq, %arg1, %c0_i32 : i32
    %1 = arith.extui %0 : i1 to i32
    %c0_i32_0 = arith.constant 0 : i32
    %2 = arith.cmpi ne, %1, %c0_i32_0 : i32
    scf.if %2 {
      %cst = arith.constant 0.000000e+00 : f32
      %9 = vector.broadcast %cst : f32 to vector<1x1x128xf32>
      %c0 = arith.constant 0 : index
      %c0_2 = arith.constant 0 : index
      %c0_3 = arith.constant 0 : index
      %10 = vector.load %arg4[%c0, %c0_2, %c0_3] : memref<1x1x128xf32, #tpu.memory_space<vmem>>, vector<1x1x128xf32>
      tpu.vector_store %arg4[%c0, %c0_2, %c0_3], %9 {strides = array<i32>} : memref<1x1x128xf32, #tpu.memory_space<vmem>>, vector<1x1x128xf32>,
      %cst_4 = arith.constant 0.000000e+00 : f32
      %11 = vector.broadcast %cst_4 : f32 to vector<1x1x128xf32>
      %c0_5 = arith.constant 0 : index
      %c0_6 = arith.constant 0 : index
      %c0_7 = arith.constant 0 : index
      %12 = vector.load %arg5[%c0_5, %c0_6, %c0_7] : memref<1x1x128xf32, #tpu.memory_space<vmem>>, vector<1x1x128xf32>
      tpu.vector_store %arg5[%c0_5, %c0_6, %c0_7], %11 {strides = array<i32>} : memref<1x1x128xf32, #tpu.memory_space<vmem>>, vector<1x1x128xf32>,
    } else {
    }
    %c2_i32 = arith.constant 2 : i32
    %3 = arith.muli %arg0, %c2_i32 : i32
    %4 = arith.addi %3, %arg1 : i32
    %c8_i32 = arith.constant 8 : i32
    %5 = arith.muli %4, %c8_i32 : i32
    %c19_i32 = arith.constant 19 : i32
    %6 = arith.cmpi slt, %5, %c19_i32 : i32
    %7 = arith.extui %6 : i1 to i32
    %c0_i32_1 = arith.constant 0 : i32
    %8 = arith.cmpi ne, %7, %c0_i32_1 : i32
    scf.if %8 {
      %c0 = arith.constant 0 : index
      %c0_2 = arith.constant 0 : index
      %9 = vector.load %arg2[%c0, %c0_2] : memref<8x128xf32, #tpu.memory_space<vmem>>, vector<8x128xf32>
      %c0_3 = arith.constant 0 : index
      %c0_4 = arith.constant 0 : index
      %10 = vector.load %arg3[%c0_3, %c0_4] : memref<8x16xi32, #tpu.memory_space<vmem>>, vector<8x16xi32>
      %11 = tpu.iota {dimensions = array<i32: 1>} : vector<1x128xi32>
      %12 = tpu.iota {dimensions = array<i32: 0>} : vector<8x1xi32>
      %13 = vector.broadcast %5 : i32 to vector<8x1xi32>
      %14 = arith.addi %12, %13 : vector<8x1xi32>
      %c16_i32 = arith.constant 16 : i32
      %15 = vector.broadcast %c16_i32 : i32 to vector<8x1xi32>
      %16 = arith.muli %14, %15 : vector<8x1xi32>
      %c3_i32 = arith.constant 3 : i32
      %17 = vector.broadcast %c3_i32 : i32 to vector<1x128xi32>
      %18 = arith.shrsi %11, %17 : vector<1x128xi32>
      %19 = vector.broadcast %16 : vector<8x1xi32> to vector<8x128xi32>
      %20 = vector.broadcast %18 : vector<1x128xi32> to vector<8x128xi32>
      %21 = arith.addi %19, %20 : vector<8x128xi32>
      %c300_i32 = arith.constant 300 : i32
      %22 = vector.broadcast %c300_i32 : i32 to vector<8x128xi32>
      %23 = arith.cmpi slt, %21, %22 : vector<8x128xi32>
      %cst = arith.constant 0.000000e+00 : f32
      %24 = vector.broadcast %cst : f32 to vector<8x128xf32>
      %25 = arith.select %23, %9, %24 : vector<8x128xi1>, vector<8x128xf32>
      %26 = tpu.iota {dimensions = array<i32: 1>} : vector<16x128xi32>
      %c3_i32_5 = arith.constant 3 : i32
      %27 = vector.broadcast %c3_i32_5 : i32 to vector<16x128xi32>
      %28 = arith.shrsi %26, %27 : vector<16x128xi32>
      %29 = tpu.iota {dimensions = array<i32: 0>} : vector<16x128xi32>
      %30 = arith.cmpi eq, %28, %29 : vector<16x128xi32>
      %31 = arith.extui %30 : vector<16x128xi1> to vector<16x128xi32>
      %32 = arith.sitofp %31 : vector<16x128xi32> to vector<16x128xf32>
      %33 = arith.sitofp %10 : vector<8x16xi32> to vector<8x16xf32>
      %cst_6 = arith.constant dense<0.000000e+00> : vector<8x128xf32>
      %34 = tpu.matmul %33, %32, %cst_6 {dimension_numbers = #tpu.dot_dimension_numbers<[1], [0], [0], [1], [0, 0, 1, 1], [], []>, precision = #tpu.contract_precision<fp32>} : vector<8x16xf32>, vector<16x128xf32>, vector<8x128xf32> -> vector<8x128xf32>
      %cst_7 = arith.constant -1.000000e+00 : f32
      %35 = vector.broadcast %cst_7 : f32 to vector<8x128xf32>
      %36 = arith.cmpf one, %34, %35 : vector<8x128xf32>
      %37 = arith.andi %36, %23 : vector<8x128xi1>
      %38 = arith.extui %37 : vector<8x128xi1> to vector<8x128xi32>
      %39 = arith.sitofp %38 : vector<8x128xi32> to vector<8x128xf32>
      %c7_i32 = arith.constant 7 : i32
      %40 = vector.broadcast %c7_i32 : i32 to vector<1x128xi32>
      %41 = arith.andi %11, %40 : vector<1x128xi32>
      %42 = arith.sitofp %41 : vector<1x128xi32> to vector<1x128xf32>
      %43 = vector.broadcast %42 : vector<1x128xf32> to vector<8x128xf32>
      %44 = arith.cmpf oeq, %43, %34 : vector<8x128xf32>
      %45 = arith.extui %44 : vector<8x128xi1> to vector<8x128xi32>
      %46 = arith.sitofp %45 : vector<8x128xi32> to vector<8x128xf32>
      %c3_i32_8 = arith.constant 3 : i32
      %47 = vector.broadcast %c3_i32_8 : i32 to vector<1x128xi32>
      %48 = arith.shrsi %11, %47 : vector<1x128xi32>
      %c1_i32 = arith.constant 1 : i32
      %49 = tpu.dynamic_rotate %11 by %c1_i32 dim 1 : vector<1x128xi32>, i32 -> vector<1x128xi32>
      %c3_i32_9 = arith.constant 3 : i32
      %50 = vector.broadcast %c3_i32_9 : i32 to vector<1x128xi32>
      %51 = arith.shrsi %49, %50 : vector<1x128xi32>
      %c1_i32_10 = arith.constant 1 : i32
      %52 = tpu.dynamic_rotate %25 by %c1_i32_10 dim 1 : vector<8x128xf32>, i32 -> vector<8x128xf32>
      %53 = arith.cmpi eq, %51, %48 : vector<1x128xi32>
      %cst_11 = arith.constant 0xFF800000 : f32
      %54 = vector.shape_cast %53 : vector<1x128xi1> to vector<1x128xi1>
      %55 = vector.broadcast %54 : vector<1x128xi1> to vector<8x128xi1>
      %56 = vector.broadcast %cst_11 : f32 to vector<8x128xf32>
      %57 = arith.select %55, %52, %56 : vector<8x128xi1>, vector<8x128xf32>
      %58 = arith.maximumf %25, %57 : vector<8x128xf32>
      %c127_i32 = arith.constant 127 : i32
      %59 = tpu.dynamic_rotate %11 by %c127_i32 dim 1 : vector<1x128xi32>, i32 -> vector<1x128xi32>
      %c3_i32_12 = arith.constant 3 : i32
      %60 = vector.broadcast %c3_i32_12 : i32 to vector<1x128xi32>
      %61 = arith.shrsi %59, %60 : vector<1x128xi32>
      %c127_i32_13 = arith.constant 127 : i32
      %62 = tpu.dynamic_rotate %58 by %c127_i32_13 dim 1 : vector<8x128xf32>, i32 -> vector<8x128xf32>
      %63 = arith.cmpi eq, %61, %48 : vector<1x128xi32>
      %cst_14 = arith.constant 0xFF800000 : f32
      %64 = vector.shape_cast %63 : vector<1x128xi1> to vector<1x128xi1>
      %65 = vector.broadcast %64 : vector<1x128xi1> to vector<8x128xi1>
      %66 = vector.broadcast %cst_14 : f32 to vector<8x128xf32>
      %67 = arith.select %65, %62, %66 : vector<8x128xi1>, vector<8x128xf32>
      %68 = arith.maximumf %58, %67 : vector<8x128xf32>
      %c2_i32_15 = arith.constant 2 : i32
      %69 = tpu.dynamic_rotate %11 by %c2_i32_15 dim 1 : vector<1x128xi32>, i32 -> vector<1x128xi32>
      %c3_i32_16 = arith.constant 3 : i32
      %70 = vector.broadcast %c3_i32_16 : i32 to vector<1x128xi32>
      %71 = arith.shrsi %69, %70 : vector<1x128xi32>
      %c2_i32_17 = arith.constant 2 : i32
      %72 = tpu.dynamic_rotate %68 by %c2_i32_17 dim 1 : vector<8x128xf32>, i32 -> vector<8x128xf32>
      %73 = arith.cmpi eq, %71, %48 : vector<1x128xi32>
      %cst_18 = arith.constant 0xFF800000 : f32
      %74 = vector.shape_cast %73 : vector<1x128xi1> to vector<1x128xi1>
      %75 = vector.broadcast %74 : vector<1x128xi1> to vector<8x128xi1>
      %76 = vector.broadcast %cst_18 : f32 to vector<8x128xf32>
      %77 = arith.select %75, %72, %76 : vector<8x128xi1>, vector<8x128xf32>
      %78 = arith.maximumf %68, %77 : vector<8x128xf32>
      %c126_i32 = arith.constant 126 : i32
      %79 = tpu.dynamic_rotate %11 by %c126_i32 dim 1 : vector<1x128xi32>, i32 -> vector<1x128xi32>
      %c3_i32_19 = arith.constant 3 : i32
      %80 = vector.broadcast %c3_i32_19 : i32 to vector<1x128xi32>
      %81 = arith.shrsi %79, %80 : vector<1x128xi32>
      %c126_i32_20 = arith.constant 126 : i32
      %82 = tpu.dynamic_rotate %78 by %c126_i32_20 dim 1 : vector<8x128xf32>, i32 -> vector<8x128xf32>
      %83 = arith.cmpi eq, %81, %48 : vector<1x128xi32>
      %cst_21 = arith.constant 0xFF800000 : f32
      %84 = vector.shape_cast %83 : vector<1x128xi1> to vector<1x128xi1>
      %85 = vector.broadcast %84 : vector<1x128xi1> to vector<8x128xi1>
      %86 = vector.broadcast %cst_21 : f32 to vector<8x128xf32>
      %87 = arith.select %85, %82, %86 : vector<8x128xi1>, vector<8x128xf32>
      %88 = arith.maximumf %78, %87 : vector<8x128xf32>
      %c4_i32 = arith.constant 4 : i32
      %89 = tpu.dynamic_rotate %11 by %c4_i32 dim 1 : vector<1x128xi32>, i32 -> vector<1x128xi32>
      %c3_i32_22 = arith.constant 3 : i32
      %90 = vector.broadcast %c3_i32_22 : i32 to vector<1x128xi32>
      %91 = arith.shrsi %89, %90 : vector<1x128xi32>
      %c4_i32_23 = arith.constant 4 : i32
      %92 = tpu.dynamic_rotate %88 by %c4_i32_23 dim 1 : vector<8x128xf32>, i32 -> vector<8x128xf32>
      %93 = arith.cmpi eq, %91, %48 : vector<1x128xi32>
      %cst_24 = arith.constant 0xFF800000 : f32
      %94 = vector.shape_cast %93 : vector<1x128xi1> to vector<1x128xi1>
      %95 = vector.broadcast %94 : vector<1x128xi1> to vector<8x128xi1>
      %96 = vector.broadcast %cst_24 : f32 to vector<8x128xf32>
      %97 = arith.select %95, %92, %96 : vector<8x128xi1>, vector<8x128xf32>
      %98 = arith.maximumf %88, %97 : vector<8x128xf32>
      %c124_i32 = arith.constant 124 : i32
      %99 = tpu.dynamic_rotate %11 by %c124_i32 dim 1 : vector<1x128xi32>, i32 -> vector<1x128xi32>
      %c3_i32_25 = arith.constant 3 : i32
      %100 = vector.broadcast %c3_i32_25 : i32 to vector<1x128xi32>
      %101 = arith.shrsi %99, %100 : vector<1x128xi32>
      %c124_i32_26 = arith.constant 124 : i32
      %102 = tpu.dynamic_rotate %98 by %c124_i32_26 dim 1 : vector<8x128xf32>, i32 -> vector<8x128xf32>
      %103 = arith.cmpi eq, %101, %48 : vector<1x128xi32>
      %cst_27 = arith.constant 0xFF800000 : f32
      %104 = vector.shape_cast %103 : vector<1x128xi1> to vector<1x128xi1>
      %105 = vector.broadcast %104 : vector<1x128xi1> to vector<8x128xi1>
      %106 = vector.broadcast %cst_27 : f32 to vector<8x128xf32>
      %107 = arith.select %105, %102, %106 : vector<8x128xi1>, vector<8x128xf32>
      %108 = arith.maximumf %98, %107 : vector<8x128xf32>
      %109 = arith.subf %25, %108 : vector<8x128xf32>
      %110 = math.exp %109 : vector<8x128xf32>
      %111 = tpu.iota {dimensions = array<i32: 0>} : vector<128x128xi32>
      %c3_i32_28 = arith.constant 3 : i32
      %112 = vector.broadcast %c3_i32_28 : i32 to vector<128x128xi32>
      %113 = arith.shrsi %111, %112 : vector<128x128xi32>
      %114 = tpu.iota {dimensions = array<i32: 1>} : vector<128x128xi32>
      %c3_i32_29 = arith.constant 3 : i32
      %115 = vector.broadcast %c3_i32_29 : i32 to vector<128x128xi32>
      %116 = arith.shrsi %114, %115 : vector<128x128xi32>
      %117 = arith.cmpi eq, %113, %116 : vector<128x128xi32>
      %118 = arith.extui %117 : vector<128x128xi1> to vector<128x128xi32>
      %119 = arith.sitofp %118 : vector<128x128xi32> to vector<128x128xf32>
      %cst_30 = arith.constant dense<0.000000e+00> : vector<8x128xf32>
      %120 = tpu.matmul %110, %119, %cst_30 {dimension_numbers = #tpu.dot_dimension_numbers<[1], [0], [0], [1], [0, 0, 1, 1], [], []>, precision = #tpu.contract_precision<fp32>} : vector<8x128xf32>, vector<128x128xf32>, vector<8x128xf32> -> vector<8x128xf32>
      %121 = tpu.reciprocal %120 {approx = true} : vector<8x128xf32> -> vector<8x128xf32>
      %122 = arith.mulf %120, %121 : vector<8x128xf32>
      %cst_31 = arith.constant 2.000000e+00 : f32
      %123 = vector.broadcast %cst_31 : f32 to vector<8x128xf32>
      %124 = arith.subf %123, %122 : vector<8x128xf32>
      %125 = arith.mulf %121, %124 : vector<8x128xf32>
      %126 = arith.mulf %110, %125 : vector<8x128xf32>
      %cst_32 = arith.constant 1.000000e+00 : f32
      %127 = vector.broadcast %cst_32 : f32 to vector<8x128xf32>
      %128 = arith.subf %127, %126 : vector<8x128xf32>
      %cst_33 = arith.constant 0.000000e+00 : f32
      %129 = vector.broadcast %cst_33 : f32 to vector<8x128xf32>
      %130 = arith.maximumf %128, %129 : vector<8x128xf32>
      %131 = math.log %130 : vector<8x128xf32>
      %cst_34 = arith.constant 6.000000e-01 : f32
      %132 = vector.broadcast %cst_34 : f32 to vector<8x128xf32>
      %133 = arith.mulf %132, %131 : vector<8x128xf32>
      %134 = math.exp %133 : vector<8x128xf32>
      %135 = arith.mulf %134, %126 : vector<8x128xf32>
      %cst_35 = arith.constant 2.000000e+00 : f32
      %136 = vector.broadcast %cst_35 : f32 to vector<8x128xf32>
      %137 = arith.mulf %136, %135 : vector<8x128xf32>
      %138 = arith.mulf %137, %46 : vector<8x128xf32>
      %cst_36 = arith.constant 9.99999997E-7 : f32
      %139 = vector.broadcast %cst_36 : f32 to vector<8x128xf32>
      %140 = arith.addf %138, %139 : vector<8x128xf32>
      %141 = arith.addf %135, %46 : vector<8x128xf32>
      %cst_37 = arith.constant 9.99999997E-7 : f32
      %142 = vector.broadcast %cst_37 : f32 to vector<8x128xf32>
      %143 = arith.addf %141, %142 : vector<8x128xf32>
      %144 = tpu.reciprocal %143 {approx = true} : vector<8x128xf32> -> vector<8x128xf32>
      %145 = arith.mulf %143, %144 : vector<8x128xf32>
      %cst_38 = arith.constant 2.000000e+00 : f32
      %146 = vector.broadcast %cst_38 : f32 to vector<8x128xf32>
      %147 = arith.subf %146, %145 : vector<8x128xf32>
      %148 = arith.mulf %144, %147 : vector<8x128xf32>
      %149 = arith.mulf %140, %148 : vector<8x128xf32>
      %cst_39 = arith.constant 1.000000e+00 : f32
      %150 = vector.broadcast %cst_39 : f32 to vector<8x128xf32>
      %151 = arith.subf %150, %149 : vector<8x128xf32>
      %c0_40 = arith.constant 0 : index
      %c0_41 = arith.constant 0 : index
      %c0_42 = arith.constant 0 : index
      %152 = vector.load %arg4[%c0_40, %c0_41, %c0_42] : memref<1x1x128xf32, #tpu.memory_space<vmem>>, vector<1x1x128xf32>
      %153 = arith.mulf %151, %39 : vector<8x128xf32>
      %cst_43 = arith.constant dense<0.000000e+00> : vector<128xf32>
      %154 = vector.multi_reduction <add>, %153, %cst_43 [0] : vector<8x128xf32> to vector<128xf32>
      %155 = vector.shape_cast %154 : vector<128xf32> to vector<1x128xf32>
      %156 = vector.shape_cast %155 : vector<1x128xf32> to vector<1x1x128xf32>
      %157 = arith.addf %152, %156 : vector<1x1x128xf32>
      %c0_44 = arith.constant 0 : index
      %c0_45 = arith.constant 0 : index
      %c0_46 = arith.constant 0 : index
      %158 = vector.load %arg4[%c0_44, %c0_45, %c0_46] : memref<1x1x128xf32, #tpu.memory_space<vmem>>, vector<1x1x128xf32>
      tpu.vector_store %arg4[%c0_44, %c0_45, %c0_46], %157 {strides = array<i32>} : memref<1x1x128xf32, #tpu.memory_space<vmem>>, vector<1x1x128xf32>,
      %c0_47 = arith.constant 0 : index
      %c0_48 = arith.constant 0 : index
      %c0_49 = arith.constant 0 : index
      %159 = vector.load %arg5[%c0_47, %c0_48, %c0_49] : memref<1x1x128xf32, #tpu.memory_space<vmem>>, vector<1x1x128xf32>
      %cst_50 = arith.constant dense<0.000000e+00> : vector<128xf32>
      %160 = vector.multi_reduction <add>, %39, %cst_50 [0] : vector<8x128xf32> to vector<128xf32>
      %161 = vector.shape_cast %160 : vector<128xf32> to vector<1x128xf32>
      %162 = vector.shape_cast %161 : vector<1x128xf32> to vector<1x1x128xf32>
      %163 = arith.addf %159, %162 : vector<1x1x128xf32>
      %c0_51 = arith.constant 0 : index
      %c0_52 = arith.constant 0 : index
      %c0_53 = arith.constant 0 : index
      %164 = vector.load %arg5[%c0_51, %c0_52, %c0_53] : memref<1x1x128xf32, #tpu.memory_space<vmem>>, vector<1x1x128xf32>
      tpu.vector_store %arg5[%c0_51, %c0_52, %c0_53], %163 {strides = array<i32>} : memref<1x1x128xf32, #tpu.memory_space<vmem>>, vector<1x1x128xf32>,
    } else {
    }
    return
  }
  func.func @transform_0(%arg0: i32, %arg1: i32) -> (i32, i32) {
    %c2_i32 = arith.constant 2 : i32
    %0 = arith.muli %arg0, %c2_i32 : i32
    %1 = arith.addi %0, %arg1 : i32
    %c2_i32_0 = arith.constant 2 : i32
    %2 = arith.minsi %1, %c2_i32_0 : i32
    %c0_i32 = arith.constant 0 : i32
    %c0_i32_1 = arith.constant 0 : i32
    return %2, %c0_i32 : i32, i32
  }
  func.func @transform_1(%arg0: i32, %arg1: i32) -> (i32, i32) {
    %c2_i32 = arith.constant 2 : i32
    %0 = arith.muli %arg0, %c2_i32 : i32
    %1 = arith.addi %0, %arg1 : i32
    %c2_i32_0 = arith.constant 2 : i32
    %2 = arith.minsi %1, %c2_i32_0 : i32
    %c0_i32 = arith.constant 0 : i32
    %c0_i32_1 = arith.constant 0 : i32
    return %2, %c0_i32 : i32, i32
  }
  func.func @transform_2(%arg0: i32, %arg1: i32) -> (i32, i32, i32) {
    %c0_i32 = arith.constant 0 : i32
    %c0_i32_0 = arith.constant 0 : i32
    %c0_i32_1 = arith.constant 0 : i32
    return %arg0, %c0_i32, %c0_i32_0 : i32, i32, i32
  }
  func.func @transform_3(%arg0: i32, %arg1: i32) -> (i32, i32, i32) {
    %c0_i32 = arith.constant 0 : i32
    %c0_i32_0 = arith.constant 0 : i32
    %c0_i32_1 = arith.constant 0 : i32
    return %arg0, %c0_i32, %c0_i32_0 : i32, i32, i32
  }
}

</mosaic_0001>

<bundles_post_ra>
// kernel: tpu_custom_call.1
= control target key start
LH: loop header
LB: loop body
LE: loop exit
PB: predicated region body
PF: predicated region fallthrough
CT: control target
= control target key end

     0   :  { %9 = vsyncpa [#allocation3], 0  ;;  %s3366_s0 = inlined_call_operand.vmem [shape: f32[19,128], index: 0, kind: input, shape index: {}]   ;;  %s3367_s1 = inlined_call_operand.vmem [shape: s32[19,16], index: 1, kind: input, shape index: {}]   ;;  %s3368_s2 = inlined_call_operand.hbm [shape: f32[2,1,128], index: 2, kind: output, shape index: {0}]   ;;  %s3369_s3 = inlined_call_operand.hbm [shape: f32[2,1,128], index: 3, kind: output, shape index: {1}]  }
   0x1   :  { %11 = vsyncpa [#allocation3 + $0x1], 0 }
   0x2   :  { %12 = vsyncpa [#allocation5], 0 }
   0x3   :  { %14 = vsyncpa [#allocation5 + $0x1], 0  ;;  %s2478_s12 = smov 0   ;;  %s2480_s13 = smov 0  }
   0x4   :  { %s2482_s14 = smov 0   ;;  %s2484_s15 = smov 0  }
   0x5   :  { %s2486_s16 = smov 0   ;;  %s2488_s17 = smov 0  }
   0x6   :  { %s2490_s18 = smov 0   ;;  %s2492_s19 = smov 0  }
   0x7 LB: > { %s1751_s20 = sadd.s32 4294967295, %s2443_s19   ;;  %s1752_s21 = sadd.s32 4294967294, %s2443_s19   ;;  %s2443_s19 = sphi %s2492_s19, %s20_s19   ;;  %s2439_s18 = sphi %s2490_s18, %s3459_s18   ;;  %s2435_s17 = sphi %s2488_s17, %s3458_s17   ;;  %s2431_s16 = sphi %s2486_s16, %s3457_s16   ;;  %s2427_s15 = sphi %s2484_s15, %s3456_s15   ;;  %s2423_s14 = sphi %s2482_s14, %s3455_s14   ;;  %s2419_s13 = sphi %s2480_s13, %s3454_s13   ;;  %s2415_s12 = sphi %s2478_s12, %s3453_s12  }
   0x8   : > { %s29_s22 = sadd.s32 1, %s2435_s17  ;;  %s32_s23 = sadd.s32 1, %s2439_s18 }
   0x9   : > { %p30_p0 = scmp.ge.s32.totalorder %s29_s22, 2  ;;  %p117_p1 = scmp.ne.s32.totalorder %s2423_s14, %s2419_s13 }
   0xa   : > { %p118_p2 = scmp.eq.s32.totalorder %s1751_s20, 3  ;;  %p123_p4 = scmp.ne.s32.totalorder %s2419_s13, %s2415_s12 }
   0xb   : > { %s3461_s22 = smov (%p30_p0, %s29_s22), 0  ;;  %s3463_s23 = smov (!%p30_p0, %s32_s23), %s2439_s18 }
   0xc   : > { %p2527_p3 = por %p118_p2, %p117_p1  ;;  %p34_p5 = scmp.ge.s32.totalorder %s3463_s23, 2 }
   0xd   : > { %p124_p6 = scmp.eq.s32.totalorder %s1752_s21, 3  ;;  %p1759_p7 = scmp.ge.s32.totalorder %s2443_s19, 1 }
   0xe   : > { %p198_p8 = scmp.lt.s32.totalorder %s2443_s19, 5  ;;  %s3465_s23 = smov (%p34_p5, %s3463_s23), 0 }
   0xf   : > { %p2537_p9 = por %p124_p6, %p123_p4  ;;  %s104_s26 = ssub.s32 %s2439_s18, %s3465_s23 }
  0x10   : > { %p199_p10 = pnand %p1759_p7, %p198_p8  ;;  %s107_s27 = sadd.s32 1, %s2423_s14 }
  0x11   : > { %p105_p11 = scmp.eq.s32.totalorder %s104_s26, 0  ;;  %s2548_s29 = sand.u32 (!%p199_p10), 1, %s2419_s13  }
  0x12   : > { %202 = sbr.rel (%p199_p10) target bundleno = 1203 (0x4b3), region = 28  ;;  %s1760_s30 = sshll.u32 (!%p199_p10), %s2431_s16, 1 }
  0x13   : > { %s2545_s28 = scalar_select %p105_p11, %s2423_s14, %s107_s27  }
  0x14   : > { %s237_s4 = sadd.s32 (!%p199_p10), %s2427_s15, %s1760_s30  ;;  %s2561_s21 = scalar_lea.vmem (!%p199_p10), [#allocation2], %s2548_s29 }
  0x15   : > { %p238_p12 = scmp.lt.s32.totalorder (!%p199_p10), %s237_s4, 2  ;;  %s2564_s26 = scalar_lea.vmem (!%p199_p10), [#allocation4], %s2548_s29 }
  0x16   : > { %p1770_p13 = scmp.ne.s32.totalorder (!%p199_p10), %s2427_s15, 0 }
  0x17   : > { %s239_s5 = scalar_select %p238_p12, %s237_s4, 2 }
  0x18   : > { %263 = sbr.rel (%p1770_p13) target bundleno = 31 (0x1f), region = 32 }
  0x19   : > { %s3467_s5 = smov (!%p238_p12, %s239_s5), 2 }
  0x1a   : > { %s1764_s6 = sshll.u32 %s3467_s5, 3 }
  0x1b   : > { %s243_s9 = scalar_lea.vmem %s3366_s0, %s1764_s6  ;;  %s2558_s20 = scalar_lea.vmem %s3367_s1, %s1764_s6 }
  0x1d   : > { %v2445_v0 = vmov 0.0  }
  0x1e   : > { %264 = vst [vmem:[%s2561_s21] sm:$0x1] %v2445_v0  ;;  %265 = vst [vmem:[%s2564_s26] sm:$0x1] %v2445_v0 }
  0x1f PF: > { %s1772_s27 = sshll.u32 %s237_s4, 3 }
  0x20   : > { %p1773_p0 = scmp.ge.s32.totalorder %s1772_s27, 19 }
  0x21   : > { %s2446_s30 = smov (!%p1773_p0), 1   ;;  %s2447_s15 = smov (!%p1773_p0), 127  }
  0x22   : > { %272 = sbr.rel (%p1773_p0) target bundleno = 1157 (0x485), region = 36  ;;  %s2448_s4 = smov (!%p1773_p0), 2  }
  0x23   : > { %s2449_s5 = smov (!%p1773_p0), 126   ;;  %s2451_s6 = smov (!%p1773_p0), 4  }
  0x24   : > { %s2452_s7 = smov (!%p1773_p0), 124  }
  0x27   : > { %v275_v1 = vlaneseq  ;;  %v279_v2 = vstv %s1772_s27  ;;  %v273_v8 = vld [vmem:[%s243_s9] sm:$0xff]  ;;  %v2450_v14 = vmov 0   ;;  %v2453_v40 = vmov 0.0  }
  0x28   : > { %v274_v39 = vld [vmem:[%s2558_s20] sm:$0xff]  ;;  %1979 = vmatprep.subr.mxu1 %v2453_v40  ;;  %1972 = vmatprep.subr.mxu0 %v2453_v40  ;;  %vm294_vm9 = vcmask 130048   ;;  %vm3370_vm11 = vmmov 0   ;;  %v2455_v47 = vmov 1.0  }
  0x29   : > { %v2569_v3 = vand.u32 127, %v275_v1  ;;  %v2571_v4 = vshrl.u32 %v275_v1, 7  ;;  %v293_v42 = vcvt.s32.f32 %v274_v39  ;;  %1976 = vmatprep.mubr.msk.f32.mxu0 %vm3370_vm11, %v2453_v40  ;;  %1983 = vmatprep.mubr.msk.f32.mxu1 %vm3370_vm11, %v2453_v40 }
  0x2b   : > { %766 = vrot.lane.b32.xlu0 %v2569_v3, %s2446_s30  ;;  %v2575_v5 = vshra.s32 %v2569_v3, 3  ;;  %v280_v6 = vadd.s32 %v279_v2, %v2571_v4  ;;  %780 = vrot.lane.b32.xlu1 %v2569_v3, %s2447_s15  ;;  %v2590_v13 = vsub.s32 0, %v2571_v4  ;;  %v2613_v38 = vadd.s32 8, %v2571_v4 }
  0x2c   : > { %v866_v44 = vadd.s32 120, %v2571_v4  ;;  %v296_v48 = vsel %vm294_vm9, %v293_v42, 0  ;;  %v865_v49 = vadd.s32 112, %v2571_v4  ;;  %v864_v55 = vadd.s32 104, %v2571_v4 }
  0x2d   : > { %v281_v7 = vmul.u32 16, %v280_v6  ;;  %vm287_vm8 = vcmp.eq.s32.totalorder %v2575_v5, %v2571_v4  ;;  %vm288_vm10 = vcmp.eq.s32.totalorder %v2575_v5, %v2613_v38  ;;  %v2650_v52 = vand.u32 4294901760, %v296_v48 }
  0x2e   : > { %v1774_v41 = vsel %vm287_vm8, 1.0, %v2453_v40  ;;  %v1775_v46 = vsel %vm288_vm10, 1.0, %v2453_v40  ;;  %1973 = vmatpush3.msk.msra.mxu0 %vm288_vm10, %v2455_v47  ;;  %v882_v53 = vshra.s32 %v866_v44, 3  ;;  %v881_v54 = vshra.s32 %v865_v49, 3 }
  0x2f   : > { %v2580_v9 = vadd.s32 %v2575_v5, %v281_v7  ;;  %v2626_v43 = vsub.f32 %v1774_v41, %v1774_v41  ;;  %v2646_v50 = vsub.f32 %v1775_v46, %v1775_v46  ;;  %1974 = vmatprep.subr.mxu0 %v2453_v40  ;;  %v863_v56 = vadd.s32 96, %v2571_v4 }
  0x30   : > { %1975 = vmatpush3.msk.msra.mxu0 %vm287_vm8, %v2455_v47  ;;  %v366_v60 = vsub.f32 %v296_v48, %v2650_v52  ;;  %vm2665_vm13 = vcmp.eq.s32.totalorder %v882_v53, %v2575_v5  ;;  %vm2675_vm14 = vcmp.eq.s32.totalorder %v881_v54, %v2575_v5  ;;  %v880_v7 = vshra.s32 %v864_v55, 3 }
  0x31   : > { %vm3372_vm0 = vcmp.lt.s32.totalorder %v2580_v9, 300  ;;  %v413_v51 = vand.u32 4294901760, %v2626_v43  ;;  %v406_v58 = vand.u32 4294901760, %v2646_v50  ;;  %1986 = vmatprep.subr.mxu0 %v2453_v40  ;;  %v1799_v6 = vsel %vm2665_vm13, 1.0, %v2453_v40 }
  0x32   : > { %v2585_v10 = vsel %vm3372_vm0, %v273_v8, 0.0  ;;  %v367_v1 = vand.u32 4294901760, %v366_v60  ;;  %v879_v8 = vshra.s32 %v863_v56, 3  ;;  %vm2689_vm15 = vcmp.eq.s32.totalorder %v880_v7, %v2575_v5 }
  0x33   : > { %769 = vrot.lane.b32.xlu0 %v2585_v10, %s2446_s30  ;;  %v414_v59 = vsub.f32 %v2626_v43, %v413_v51  ;;  %v407_v0 = vsub.f32 %v2646_v50, %v406_v58  ;;  %v860_v53 = vadd.s32 72, %v2571_v4  ;;  %v859_v56 = vadd.s32 64, %v2571_v4 }
  0x35   : > { %v876_v55 = vshra.s32 %v860_v53, 3  ;;  %v854_v53 = vadd.s32 24, %v2571_v4 }
  0x37   : > { %794 = vrot.lane.b32.xlu0 %v2569_v3, %s2448_s4 }
  0x3b   : > { %808 = vrot.lane.b32.xlu0 %v2569_v3, %s2449_s5 }
  0x3f   : > { %822 = vrot.lane.b32.xlu0 %v2569_v3, %s2451_s6 }
  0x43   : > { %836 = vrot.lane.b32.xlu0 %v2569_v3, %s2452_s7 }
  0x9d   : > { %v767_v11 = vpop.permute.xlu0 %766  ;;  %v781_v20 = vpop.permute.xlu1 %780 }
  0x9e   : > { %v768_v12 = vshra.s32 %v767_v11, 3  ;;  %v782_v21 = vshra.s32 %v781_v20, 3  ;;  %v408_v11 = vand.u32 4294901760, %v407_v0  ;;  %v2693_v20 = vsub.f32 %v1799_v6, %v1799_v6 }
  0xa0   : > { %vm771_vm1 = vcmp.eq.s32.totalorder %v768_v12, %v2575_v5  ;;  %vm785_vm3 = vcmp.eq.s32.totalorder %v782_v21, %v2575_v5  ;;  %v415_v12 = vand.u32 4294901760, %v414_v59  ;;  %1980 = vmatpush3.msra.mxu1 %v408_v11 }
  0xa1   : > { %v772_v15 = vsel %vm771_vm1, 1, %v2450_v14  ;;  %v786_v22 = vsel %vm785_vm3, 1, %v2450_v14  ;;  %vm2696_vm1 = vcmp.eq.s32.totalorder %v879_v8, %v2575_v5  ;;  %1981 = vmatprep.subr.mxu1 %v2453_v40 }
  0xa2   : > { %v776_v16 = vrot.slane %v772_v15, %v2590_v13  ;;  %v790_v23 = vrot.slane %v786_v22, %v2590_v13  ;;  %v368_v15 = vsub.f32 %v366_v60, %v367_v1  ;;  %v1797_v22 = vsel %vm2689_vm15, 1.0, %v2453_v40  ;;  %1982 = vmatpush3.msra.mxu1 %v415_v12 }
  0xa3   : > { %1993 = vmatprep.subr.mxu1 %v2453_v40  ;;  %1984 = vmatmul.mubr.f32.vlgmr.msra.gmra.mxu1 %v2650_v52 }
  0xa4   : > { %vm777_vm2 = vcmp.eq.s32.totalorder %v776_v16, 1  ;;  %vm791_vm4 = vcmp.eq.s32.totalorder %v790_v23, 1  ;;  %v862_v16 = vadd.s32 88, %v2571_v4  ;;  %1994 = vmatpush3.msk.msra.mxu1 %vm288_vm10, %v2455_v47  ;;  %1997 = vmatprep.mubr.msk.f32.mxu1 %vm3370_vm11, %v2453_v40 }
  0xa5   : > { %v770_v17 = vpop.permute.xlu0 %769  ;;  %1995 = vmatprep.subr.mxu1 %v2453_v40 }
  0xa6   : > { %v778_v18 = vsel %vm777_vm2, %v770_v17, -inf  ;;  %v1798_v17 = vsel %vm2675_vm14, 1.0, %v2453_v40  ;;  %v878_v23 = vshra.s32 %v862_v16, 3  ;;  %1996 = vmatpush3.msk.msra.mxu1 %vm287_vm8, %v2455_v47 }
  0xa7   : > { %v779_v19 = vmax.f32 %v2585_v10, %v778_v18  ;;  %2007 = vmatprep.subr.mxu1 %v2453_v40  ;;  %1998 = vmatmul.mubr.f32.vlgmr.msra.gmra.mxu1 %v367_v1 }
  0xa8   : > { %vm2712_vm2 = vcmp.eq.s32.totalorder %v878_v23, %v2575_v5  ;;  %2008 = vmatpush3.msk.msra.mxu1 %vm288_vm10, %v2455_v47  ;;  %2011 = vmatprep.mubr.msk.f32.mxu1 %vm3370_vm11, %v2453_v40 }
  0xa9   : > { %783 = vrot.lane.b32.xlu1 %v779_v19, %s2447_s15  ;;  %v795_v27 = vpop.permute.xlu0 %794  ;;  %2009 = vmatprep.subr.mxu1 %v2453_v40 }
  0xaa   : > { %v796_v28 = vshra.s32 %v795_v27, 3  ;;  %v1025_v27 = vand.u32 4294901760, %v2693_v20  ;;  %2010 = vmatpush3.msk.msra.mxu1 %vm287_vm8, %v2455_v47 }
  0xab   : > { %2049 = vmatprep.subr.mxu1 %v2453_v40  ;;  %2012 = vmatmul.mubr.f32.vlgmr.msra.gmra.mxu1 %v2650_v52 }
  0xac   : > { %vm799_vm5 = vcmp.eq.s32.totalorder %v796_v28, %v2575_v5  ;;  %v2722_v28 = vsub.f32 %v1797_v22, %v1797_v22  ;;  %2081 = vmatprep.mubr.msk.f32.mxu1 %vm3370_vm11, %v2453_v40 }
  0xad   : > { %v800_v29 = vsel %vm799_vm5, 1, %v2450_v14  ;;  %v809_v34 = vpop.permute.xlu0 %808  ;;  %vm2830_vm5 = vcmp.eq.s32.totalorder %v876_v55, %v2575_v5 }
  0xae   : > { %v804_v30 = vrot.slane %v800_v29, %v2590_v13  ;;  %v810_v35 = vshra.s32 %v809_v34, 3  ;;  %v1795_v29 = vsel %vm2712_vm2, 1.0, %v2453_v40  ;;  %v1793_v1 = vsel %vm2830_vm5, 1.0, %v2453_v40 }
  0xaf   : > { %v2746_v34 = vsub.f32 %v1795_v29, %v1795_v29  ;;  %v2844_v7 = vsub.f32 %v1793_v1, %v1793_v1  ;;  %v856_v29 = vadd.s32 40, %v2571_v4  ;;  %v3421_v1 = vmov 0 }
  0xb0   : > { %vm805_vm6 = vcmp.eq.s32.totalorder %v804_v30, 1  ;;  %vm813_vm7 = vcmp.eq.s32.totalorder %v810_v35, %v2575_v5 }
  0xb1   : > { %v814_v36 = vsel %vm813_vm7, 1, %v2450_v14  ;;  %v1053_v41 = vand.u32 4294901760, %v2746_v34  ;;  %v823_v49 = vpop.permute.xlu0 %822  ;;  %v3441_v2 = vand.u32 4294901760, %v2844_v7 }
  0xb2   : > { %v818_v37 = vrot.slane %v814_v36, %v2590_v13 }
  0xb3   : > { %v1054_v45 = vsub.f32 %v2746_v34, %v1053_v41 }
  0xb4   : > { %vm2633_vm12 = vcmp.eq.s32.totalorder %v818_v37, 1 }
  0xb5   : > { %v1055_v48 = vand.u32 4294901760, %v1054_v45 }
 0x11b   : > { %v784_v24 = vpop.permute.xlu1 %783 }
 0x11c   : > { %v792_v25 = vsel %vm791_vm4, %v784_v24, -inf  ;;  %v2704_v24 = vsub.f32 %v1798_v17, %v1798_v17  ;;  %v3382_v17 = vand.u32 4294901760, %v2844_v7 }
 0x11d   : > { %v793_v26 = vmax.f32 %v779_v19, %v792_v25  ;;  %v369_v19 = vand.u32 4294901760, %v368_v15  ;;  %v1796_v25 = vsel %vm2696_vm1, 1.0, %v2453_v40  ;;  %v857_v15 = vadd.s32 48, %v2571_v4 }
 0x11e   : > { %v1032_v30 = vand.u32 4294901760, %v2704_v24 }
 0x11f   : > { %797 = vrot.lane.b32.xlu1 %v793_v26, %s2448_s4  ;;  %1977 = vmatmul.mubr.f32.vlgmr.msra.gmra.mxu0 %v369_v19 }
 0x120   : > { %1987 = vmatpush3.msra.mxu0 %v2646_v50  ;;  %1990 = vmatprep.mubr.msk.f32.mxu0 %vm3370_vm11, %v2453_v40  ;;  %v1033_v35 = vsub.f32 %v2704_v24, %v1032_v30  ;;  %v824_v50 = vshra.s32 %v823_v49, 3 }
 0x121   : > { %1988 = vmatprep.subr.mxu0 %v2453_v40 }
 0x122   : > { %1989 = vmatpush3.msra.mxu0 %v2626_v43  ;;  %v1034_v42 = vand.u32 4294901760, %v1033_v35  ;;  %vm827_vm3 = vcmp.eq.s32.totalorder %v824_v50, %v2575_v5 }
 0x123   : > { %1991 = vmatmul.mubr.f32.vlgmr.msra.gmra.mxu0 %v366_v60  ;;  %2000 = vmatprep.subr.mxu0 %v2453_v40  ;;  %v875_v60 = vshra.s32 %v859_v56, 3  ;;  %v828_v0 = vsel %vm827_vm3, 1, %v2450_v14 }
 0x124   : > { %2001 = vmatpush3.msra.mxu0 %v406_v58  ;;  %2004 = vmatprep.mubr.msk.f32.mxu0 %vm3370_vm11, %v2453_v40  ;;  %v832_v22 = vrot.slane %v828_v0, %v2590_v13 }
 0x125   : > { %2002 = vmatprep.subr.mxu0 %v2453_v40 }
 0x126   : > { %2003 = vmatpush3.msra.mxu0 %v413_v51  ;;  %v861_v51 = vadd.s32 80, %v2571_v4 }
 0x127   : > { %2005 = vmatmul.mubr.f32.vlgmr.msra.gmra.mxu0 %v2650_v52  ;;  %2014 = vmatprep.subr.mxu0 %v2453_v40 }
 0x128   : > { %2015 = vmatpush3.msk.msra.mxu0 %vm2665_vm13, %v2455_v47  ;;  %2046 = vmatprep.mubr.msk.f32.mxu0 %vm3370_vm11, %v2453_v40  ;;  %v877_v52 = vshra.s32 %v861_v51, 3 }
 0x129   : > { %2016 = vmatprep.subr.mxu0 %v2453_v40 }
 0x12a   : > { %2017 = vmatpush3.msk.msra.mxu0 %vm2675_vm14, %v2455_v47  ;;  %vm2816_vm4 = vcmp.eq.s32.totalorder %v877_v52, %v2575_v5 }
 0x12b   : > { %2018 = vmatprep.subr.mxu0 %v2453_v40 }
 0x12c   : > { %2019 = vmatpush3.msk.msra.mxu0 %vm2689_vm15, %v2455_v47 }
 0x12d   : > { %2020 = vmatprep.subr.mxu0 %v2453_v40 }
 0x12e   : > { %2021 = vmatpush3.msk.msra.mxu0 %vm2696_vm1, %v2455_v47 }
 0x12f   : > { %2022 = vmatprep.subr.mxu0 %v2453_v40 }
 0x130   : > { %2023 = vmatpush3.msk.msra.mxu0 %vm2712_vm2, %v2455_v47 }
 0x131   : > { %2024 = vmatprep.subr.mxu0 %v2453_v40 }
 0x132   : > { %2025 = vmatpush3.msk.msra.mxu0 %vm2816_vm4, %v2455_v47 }
 0x133   : > { %2026 = vmatprep.subr.mxu0 %v2453_v40 }
 0x134   : > { %2027 = vmatpush3.msk.msra.mxu0 %vm2830_vm5, %v2455_v47 }
 0x135   : > { %2028 = vmatprep.subr.mxu0 %v2453_v40 }
 0x191   : > { %v798_v31 = vpop.permute.xlu1 %797 }
 0x192   : > { %v806_v32 = vsel %vm805_vm6, %v798_v31, -inf  ;;  %v2735_v31 = vsub.f32 %v1796_v25, %v1796_v25  ;;  %vm2847_vm6 = vcmp.eq.s32.totalorder %v875_v60, %v2575_v5  ;;  %v873_v25 = vshra.s32 %v857_v15, 3 }
 0x193   : > { %v807_v33 = vmax.f32 %v793_v26, %v806_v32  ;;  %v1026_v32 = vsub.f32 %v2693_v20, %v1025_v27  ;;  %v1792_v12 = vsel %vm2847_vm6, 1.0, %v2453_v40  ;;  %2029 = vmatpush3.msk.msra.mxu0 %vm2847_vm6, %v2455_v47  ;;  %v853_v60 = vadd.s32 16, %v2571_v4 }
 0x194   : > { %v1046_v36 = vand.u32 4294901760, %v2735_v31  ;;  %v2863_v19 = vsub.f32 %v1792_v12, %v1792_v12  ;;  %2030 = vmatprep.subr.mxu0 %v2453_v40  ;;  %vm2885_vm8 = vcmp.eq.s32.totalorder %v873_v25, %v2575_v5  ;;  %v3431_v12 = vmov 0 }
 0x195   : > { %811 = vrot.lane.b32.xlu1 %v807_v33, %s2449_s5  ;;  %v1027_v37 = vand.u32 4294901760, %v1026_v32  ;;  %v868_v32 = vshra.s32 %v2613_v38, 3  ;;  %v872_v38 = vshra.s32 %v856_v29, 3  ;;  %v1790_v49 = vsel %vm2885_vm8, 1.0, %v2453_v40 }
 0x196   : > { %v1047_v43 = vsub.f32 %v2735_v31, %v1046_v36  ;;  %v2903_v50 = vsub.f32 %v1790_v49, %v1790_v49  ;;  %v869_v25 = vshra.s32 %v853_v60, 3  ;;  %v867_v60 = vshra.s32 %v2571_v4, 3 }
 0x197   : > { %2050 = vmatpush3.msra.mxu1 %v1027_v37  ;;  %v1068_v37 = vsub.f32 %v2844_v7, %v3382_v17  ;;  %vm2906_vm9 = vcmp.eq.s32.totalorder %v872_v38, %v2575_v5  ;;  %vm2965_vm0 = vcmp.eq.s32.totalorder %v868_v32, %v2575_v5  ;;  %v3442_v18 = vand.u32 4294901760, %v2863_v19 }
 0x198   : > { %2051 = vmatprep.subr.mxu1 %v2453_v40  ;;  %v1048_v46 = vand.u32 4294901760, %v1047_v43  ;;  %vm2960_vm11 = vcmp.eq.s32.totalorder %v869_v25, %v2575_v5  ;;  %v3445_v21 = vand.u32 4294901760, %v2903_v50 }
 0x199   : > { %2052 = vmatpush3.msra.mxu1 %v1034_v42  ;;  %v1069_v45 = vand.u32 4294901760, %v1068_v37  ;;  %v3425_v37 = vmov 0  ;;  %v1786_v32 = vsel %vm2960_vm11, 1.0, %v2453_v40 }
 0x19a   : > { %2053 = vmatprep.subr.mxu1 %v2453_v40 }
 0x207   : > { %v812_v57 = vpop.permute.xlu1 %811 }
 0x208   : > { %v820_v62 = vsel %vm2633_vm12, %v812_v57, -inf  ;;  %v1794_v57 = vsel %vm2816_vm4, 1.0, %v2453_v40  ;;  %vm2930_vm12 = vcmp.eq.s32.totalorder %v832_v22, 1 }
 0x209   : > { %v2671_v63 = vmax.f32 %v807_v33, %v820_v62  ;;  %v1039_v33 = vand.u32 4294901760, %v2722_v28  ;;  %v2827_v58 = vsub.f32 %v1794_v57, %v1794_v57  ;;  %v858_v62 = vadd.s32 56, %v2571_v4 }
 0x20a   : > { %v1789_v57 = vsel %vm2906_vm9, 1.0, %v2453_v40 }
 0x20b   : > { %825 = vrot.lane.b32.xlu1 %v2671_v63, %s2451_s6  ;;  %v1040_v39 = vsub.f32 %v2722_v28, %v1039_v33  ;;  %v3383_v6 = vand.u32 4294901760, %v2827_v58  ;;  %v874_v11 = vshra.s32 %v858_v62, 3  ;;  %v3379_v62 = vand.u32 4294901760, %v2903_v50 }
 0x20c   : > { %v2922_v0 = vsub.f32 %v1789_v57, %v1789_v57  ;;  %v1785_v57 = vsel %vm2965_vm0, 1.0, %v2453_v40  ;;  %v3440_v61 = vand.u32 4294901760, %v2827_v58 }
 0x20d   : > { %v1041_v44 = vand.u32 4294901760, %v1040_v39  ;;  %v1061_v16 = vsub.f32 %v2827_v58, %v3383_v6  ;;  %vm2868_vm7 = vcmp.eq.s32.totalorder %v874_v11, %v2575_v5  ;;  %v3381_v39 = vand.u32 4294901760, %v2863_v19 }
 0x20e   : > { %2031 = vmatpush3.msk.msra.mxu0 %vm2868_vm7, %v2455_v47  ;;  %v1791_v42 = vsel %vm2868_vm7, 1.0, %v2453_v40  ;;  %v870_v11 = vshra.s32 %v854_v53, 3  ;;  %v1089_v22 = vsub.f32 %v2903_v50, %v3379_v62  ;;  %v3378_v29 = vand.u32 4294901760, %v2922_v0 }
 0x20f   : > { %2054 = vmatpush3.msra.mxu1 %v1041_v44  ;;  %v1062_v35 = vand.u32 4294901760, %v1061_v16  ;;  %v855_v44 = vadd.s32 32, %v2571_v4  ;;  %2032 = vmatprep.subr.mxu0 %v2453_v40 }
 0x210   : > { %2055 = vmatprep.subr.mxu1 %v2453_v40  ;;  %2033 = vmatpush3.msk.msra.mxu0 %vm2885_vm8, %v2455_v47  ;;  %vm2951_vm3 = vcmp.eq.s32.totalorder %v870_v11, %v2575_v5  ;;  %v1096_v49 = vsub.f32 %v2922_v0, %v3378_v29 }
 0x211   : > { %2056 = vmatpush3.msra.mxu1 %v1048_v46  ;;  %v1075_v46 = vsub.f32 %v2863_v19, %v3381_v39  ;;  %v871_v52 = vshra.s32 %v855_v44, 3  ;;  %2034 = vmatprep.subr.mxu0 %v2453_v40  ;;  %v3426_v37 = vsel %vm2951_vm3, 4294967295, %v3425_v37  ;;  %v1787_v38 = vsel %vm2951_vm3, 1.0, %v2453_v40 }
 0x212   : > { %2057 = vmatprep.subr.mxu1 %v2453_v40  ;;  %2035 = vmatpush3.msk.msra.mxu0 %vm2906_vm9, %v2455_v47  ;;  %v3427_v44 = vmov 0  ;;  %v2976_v53 = vsub.f32 %v1787_v38, %v1787_v38 }
 0x213   : > { %2058 = vmatpush3.msra.mxu1 %v1055_v48  ;;  %v2894_v48 = vsub.f32 %v1791_v42, %v1791_v42  ;;  %v1076_v55 = vand.u32 4294901760, %v1075_v46  ;;  %vm2925_vm10 = vcmp.eq.s32.totalorder %v871_v52, %v2575_v5  ;;  %2036 = vmatprep.subr.mxu0 %v2453_v40  ;;  %v3428_v44 = vsel %vm2960_vm11, 4294967295, %v3427_v44 }
 0x214   : > { %2059 = vmatprep.subr.mxu1 %v2453_v40  ;;  %v3422_v1 = vsel %vm2925_vm10, 4294967295, %v3421_v1  ;;  %v1788_v16 = vsel %vm2925_vm10, 1.0, %v2453_v40  ;;  %2037 = vmatpush3.msk.msra.mxu0 %vm2925_vm10, %v2455_v47  ;;  %v1090_v46 = vand.u32 4294901760, %v1089_v22  ;;  %v3375_v25 = vand.u32 4294901760, %v2976_v53 }
 0x215   : > { %2060 = vmatpush3.msra.mxu1 %v1062_v35  ;;  %v3380_v56 = vand.u32 4294901760, %v2894_v48  ;;  %v2948_v35 = vsub.f32 %v1788_v16, %v1788_v16  ;;  %2038 = vmatprep.subr.mxu0 %v2453_v40  ;;  %v3000_v22 = vsub.f32 %v1786_v32, %v1786_v32 }
 0x216   : > { %2061 = vmatprep.subr.mxu1 %v2453_v40  ;;  %2039 = vmatpush3.msk.msra.mxu0 %vm2951_vm3, %v2455_v47 }
 0x217   : > { %2062 = vmatpush3.msra.mxu1 %v1069_v45  ;;  %v1082_v15 = vsub.f32 %v2894_v48, %v3380_v56  ;;  %v3429_v45 = vmov 0  ;;  %v3376_v52 = vand.u32 4294901760, %v2948_v35  ;;  %2040 = vmatprep.subr.mxu0 %v2453_v40  ;;  %v3447_v26 = vand.u32 4294901760, %v2948_v35 }
 0x218   : > { %2063 = vmatprep.subr.mxu1 %v2453_v40  ;;  %v3430_v45 = vsel %vm2965_vm0, 4294967295, %v3429_v45  ;;  %2041 = vmatpush3.msk.msra.mxu0 %vm2960_vm11, %v2455_v47 }
 0x219   : > { %2064 = vmatpush3.msra.mxu1 %v1076_v55  ;;  %v1083_v42 = vand.u32 4294901760, %v1082_v15  ;;  %v1097_v15 = vand.u32 4294901760, %v1096_v49  ;;  %v1103_v16 = vsub.f32 %v2948_v35, %v3376_v52  ;;  %2042 = vmatprep.subr.mxu0 %v2453_v40  ;;  %v1110_v49 = vsub.f32 %v2976_v53, %v3375_v25 }
 0x21a   : > { %2065 = vmatprep.subr.mxu1 %v2453_v40  ;;  %2043 = vmatpush3.msk.msra.mxu0 %vm2965_vm0, %v2455_v47  ;;  %vm3433_vm0 = vcmp.lt.s32.totalorder %v2580_v9, 300 }
 0x21b   : > { %2066 = vmatpush3.msra.mxu1 %v1083_v42  ;;  %v3002_v42 = vsub.f32 %v1785_v57, %v1785_v57  ;;  %v1104_v38 = vand.u32 4294901760, %v1103_v16  ;;  %v1111_v57 = vand.u32 4294901760, %v1110_v49  ;;  %2044 = vmatprep.subr.mxu0 %v2453_v40 }
 0x21c   : > { %2067 = vmatprep.subr.mxu1 %v2453_v40 }
 0x21d   : > { %2068 = vmatpush3.msra.mxu1 %v1090_v46  ;;  %v3374_v46 = vand.u32 4294901760, %v3000_v22 }
 0x21e   : > { %2069 = vmatprep.subr.mxu1 %v2453_v40 }
 0x21f   : > { %2070 = vmatpush3.msra.mxu1 %v1097_v15 }
 0x220   : > { %2071 = vmatprep.subr.mxu1 %v2453_v40 }
 0x221   : > { %2072 = vmatpush3.msra.mxu1 %v1104_v38 }
 0x222   : > { %2073 = vmatprep.subr.mxu1 %v2453_v40 }
 0x223   : > { %2074 = vmatpush3.msra.mxu1 %v1111_v57  ;;  %v452_v57 = vpop.f32.mrf.mxu1 }
 0x224   : > { %2075 = vmatprep.subr.mxu1 %v2453_v40 }
 0x27d   : > { %v826_v55 = vpop.permute.xlu1 %825 }
 0x27e   : > { %v834_v11 = vsel %vm2930_vm12, %v826_v55, -inf  ;;  %vm3005_vm12 = vcmp.eq.s32.totalorder %v867_v60, %v2575_v5  ;;  %v3373_v55 = vand.u32 4294901760, %v3002_v42  ;;  %v1117_v60 = vsub.f32 %v3000_v22, %v3374_v46  ;;  %v1985_v46 = vpop.f32.mrf.mxu1 }
 0x27f   : > { %v2998_v4 = vmax.f32 %v2671_v63, %v834_v11  ;;  %v3432_v12 = vsel %vm3005_vm12, 4294967295, %v3431_v12  ;;  %v1784_v63 = vsel %vm3005_vm12, 1.0, %v2453_v40  ;;  %2045 = vmatpush3.msk.msra.mxu0 %vm3005_vm12, %v2455_v47 }
 0x280   : > { %v3023_v32 = vsub.f32 %v1784_v63, %v1784_v63  ;;  %v1124_v11 = vsub.f32 %v3002_v42, %v3373_v55  ;;  %2084 = vmatprep.subr.mxu0 %v2453_v40  ;;  %v1118_v16 = vand.u32 4294901760, %v1117_v60  ;;  %v371_v55 = vpop.f32.mrf.mxu0  ;;  %v603_v52 = vpop.f32.mrf.mxu1 }
 0x281   : > { %839 = vrot.lane.b32.xlu1 %v2998_v4, %s2452_s7  ;;  %v453_v60 = vadd.f32 %v452_v57, %v371_v55 }
 0x282   : > { %v3377_v15 = vand.u32 4294901760, %v3023_v32  ;;  %v1125_v38 = vand.u32 4294901760, %v1124_v11  ;;  %2076 = vmatpush3.msra.mxu1 %v1118_v16  ;;  %v1978_v11 = vpop.f32.mrf.mxu0  ;;  %v1999_v62 = vpop.f32.mrf.mxu1 }
 0x283   : > { %2077 = vmatprep.subr.mxu1 %v2453_v40 }
 0x284   : > { %v1131_v49 = vsub.f32 %v3023_v32, %v3377_v15  ;;  %2078 = vmatpush3.msra.mxu1 %v1125_v38  ;;  %v528_v25 = vpop.f32.mrf.mxu0  ;;  %v753_v56 = vpop.f32.mrf.mxu1 }
 0x285   : > { %2079 = vmatprep.subr.mxu1 %v2453_v40  ;;  %v529_v15 = vadd.f32 %v528_v25, %v453_v60 }
 0x286   : > { %v1132_v63 = vand.u32 4294901760, %v1131_v49  ;;  %v1992_v29 = vpop.f32.mrf.mxu0  ;;  %v2013_v17 = vpop.f32.mrf.mxu1 }
 0x287   : > { %v604_v16 = vadd.f32 %v603_v52, %v529_v15  ;;  %v1606_v15 = vld [vmem:[%s2564_s26] sm:$0x1] }
 0x288   : > { %2080 = vmatpush3.msra.mxu1 %v1132_v63  ;;  %v680_v49 = vpop.f32.mrf.mxu0  ;;  %v837_v63 = vpop.permute.xlu0 %836 }
 0x289   : > { %2119 = vmatprep.subr.mxu1 %v2453_v40  ;;  %v681_v39 = vadd.f32 %v680_v49, %v604_v16  ;;  %v838_v55 = vshra.s32 %v837_v63, 3 }
 0x28a   : > { %v2006_v38 = vpop.f32.mrf.mxu0 }
 0x28b   : > { %v3046_v6 = vadd.f32 %v753_v56, %v681_v39  ;;  %vm841_vm3 = vcmp.eq.s32.totalorder %v838_v55, %v2575_v5 }
 0x28c   : > { %v842_v39 = vsel %vm841_vm3, 1, %v2450_v14  ;;  %vm3437_vm3 = vnez %v3428_v44 }
 0x28d   : > { %vm757_vm12 = vcmp.ne.f32.partialorder %v3046_v6, -1.0  ;;  %v846_v25 = vrot.slane %v842_v39, %v2590_v13 }
 0x28e   : > { %vm758_vm11 = vmand %vm757_vm12, %vm3433_vm0  ;;  %vm3434_vm0 = vmmov 0   ;;  %vm3438_vm12 = vnez %v3430_v45 }
 0x28f   : > { %v3052_v29 = vsel %vm758_vm11, 1.0, %v2453_v40  ;;  %vm847_vm10 = vcmp.eq.s32.totalorder %v846_v25, 1  ;;  %vm3435_vm11 = vnez %v3422_v1 }
 0x290   : > { %v1607_v62 = vrot.slane %v3052_v29, 4 }
 0x292   : > { %v1608_v52 = vadd.f32 %v3052_v29, %v1607_v62  ;;  %v761_v62 = vand.u32 7, %v2569_v3 }
 0x294   : > { %v1609_v17 = vrot.slane %v1608_v52, 2 }
 0x296   : > { %v1610_v56 = vadd.f32 %v1609_v17, %v1608_v52  ;;  %v762_v52 = vcvt.s32.f32 %v761_v62 }
 0x298   : > { %v1611_v46 = vrot.slane %v1610_v56, 1 }
 0x29a   : > { %v1612_v9 = vadd.f32 %v1611_v46, %v1610_v56 }
 0x29c   : > { %v1613_v57 = vadd.f32 %v1612_v9, %v1606_v15 }
 0x29e   : > { %1614 = vst [vmem:[%s2564_s26] sm:$0x1] %v1613_v57 }
 0x2f3   : > { %v840_v60 = vpop.permute.xlu1 %839 }
 0x2f4   : > { %v848_v11 = vsel %vm847_vm10, %v840_v60, -inf  ;;  %vm3436_vm10 = vnez %v3426_v37 }
 0x2f5   : > { %v849_v16 = vmax.f32 %v2998_v4, %v848_v11 }
 0x2f7   : > { %v850_v5 = vsub.f32 %v2585_v10, %v849_v16 }
 0x2f9   : > { %v851_v49 = vmul.f32 1.442695, %v850_v5 }
 0x2fb   : > { %2311 = vpow2.f32 %v851_v49 }
 0x308   : > { %v3063_v38 = vpop.eup %2311 }
 0x309   : > { %v3066_v14 = vand.u32 4294901760, %v3063_v38 }
 0x30b   : > { %2082 = vmatmul.mubr.f32.vlgmr.msra.gmra.mxu1 %v3066_v14  ;;  %v3071_v13 = vsub.f32 %v3063_v38, %v3066_v14 }
 0x30c   : > { %2120 = vmatpush3.msk.msra.mxu1 %vm2665_vm13, %v2455_v47  ;;  %2151 = vmatprep.mubr.msk.f32.mxu1 %vm3434_vm0, %v2453_v40 }
 0x30d   : > { %2121 = vmatprep.subr.mxu1 %v2453_v40  ;;  %v1014_v10 = vand.u32 4294901760, %v3071_v13 }
 0x30e   : > { %2122 = vmatpush3.msk.msra.mxu1 %vm2675_vm14, %v2455_v47 }
 0x30f   : > { %2123 = vmatprep.subr.mxu1 %v2453_v40  ;;  %v1015_v4 = vsub.f32 %v3071_v13, %v1014_v10 }
 0x310   : > { %2124 = vmatpush3.msk.msra.mxu1 %vm2689_vm15, %v2455_v47 }
 0x311   : > { %2125 = vmatprep.subr.mxu1 %v2453_v40  ;;  %v1016_v63 = vand.u32 4294901760, %v1015_v4  ;;  %v1596_v4 = vld [vmem:[%s2561_s21] sm:$0x1] }
 0x312   : > { %2126 = vmatpush3.msk.msra.mxu1 %vm2696_vm1, %v2455_v47 }
 0x313   : > { %2127 = vmatprep.subr.mxu1 %v2453_v40  ;;  %2047 = vmatmul.mubr.f32.vlgmr.msra.gmra.mxu0 %v1016_v63 }
 0x314   : > { %2085 = vmatpush3.msra.mxu0 %v2693_v20  ;;  %2128 = vmatpush3.msk.msra.mxu1 %vm2712_vm2, %v2455_v47  ;;  %v3443_v20 = vand.u32 4294901760, %v2894_v48 }
 0x315   : > { %2086 = vmatprep.subr.mxu0 %v2453_v40  ;;  %2129 = vmatprep.subr.mxu1 %v2453_v40 }
 0x316   : > { %2087 = vmatpush3.msra.mxu0 %v2704_v24  ;;  %2130 = vmatpush3.msk.msra.mxu1 %vm2816_vm4, %v2455_v47  ;;  %v3446_v24 = vand.u32 4294901760, %v2922_v0 }
 0x317   : > { %2088 = vmatprep.subr.mxu0 %v2453_v40  ;;  %2131 = vmatprep.subr.mxu1 %v2453_v40 }
 0x318   : > { %2089 = vmatpush3.msra.mxu0 %v2722_v28  ;;  %2132 = vmatpush3.msk.msra.mxu1 %vm2830_vm5, %v2455_v47  ;;  %v3449_v28 = vand.u32 4294901760, %v3000_v22 }
 0x319   : > { %2090 = vmatprep.subr.mxu0 %v2453_v40  ;;  %2133 = vmatprep.subr.mxu1 %v2453_v40 }
 0x31a   : > { %2091 = vmatpush3.msra.mxu0 %v2735_v31  ;;  %2134 = vmatpush3.msk.msra.mxu1 %vm2847_vm6, %v2455_v47 }
 0x31b   : > { %2092 = vmatprep.subr.mxu0 %v2453_v40  ;;  %2135 = vmatprep.subr.mxu1 %v2453_v40 }
 0x31c   : > { %2093 = vmatpush3.msra.mxu0 %v2746_v34  ;;  %2136 = vmatpush3.msk.msra.mxu1 %vm2868_vm7, %v2455_v47 }
 0x31d   : > { %2094 = vmatprep.subr.mxu0 %v2453_v40  ;;  %2137 = vmatprep.subr.mxu1 %v2453_v40 }
 0x31e   : > { %2095 = vmatpush3.msra.mxu0 %v2827_v58  ;;  %2138 = vmatpush3.msk.msra.mxu1 %vm2885_vm8, %v2455_v47 }
 0x31f   : > { %2096 = vmatprep.subr.mxu0 %v2453_v40  ;;  %2139 = vmatprep.subr.mxu1 %v2453_v40 }
 0x320   : > { %2097 = vmatpush3.msra.mxu0 %v2844_v7  ;;  %2140 = vmatpush3.msk.msra.mxu1 %vm2906_vm9, %v2455_v47 }
 0x321   : > { %2098 = vmatprep.subr.mxu0 %v2453_v40  ;;  %2141 = vmatprep.subr.mxu1 %v2453_v40 }
 0x322   : > { %2099 = vmatpush3.msra.mxu0 %v2863_v19  ;;  %2142 = vmatpush3.msk.msra.mxu1 %vm3435_vm11, %v2455_v47 }
 0x323   : > { %2100 = vmatprep.subr.mxu0 %v2453_v40  ;;  %2143 = vmatprep.subr.mxu1 %v2453_v40 }
 0x324   : > { %2101 = vmatpush3.msra.mxu0 %v2894_v48  ;;  %2144 = vmatpush3.msk.msra.mxu1 %vm3436_vm10, %v2455_v47  ;;  %vm3439_vm10 = vnez %v3432_v12 }
 0x325   : > { %2102 = vmatprep.subr.mxu0 %v2453_v40  ;;  %2145 = vmatprep.subr.mxu1 %v2453_v40 }
 0x326   : > { %2103 = vmatpush3.msra.mxu0 %v2903_v50  ;;  %2146 = vmatpush3.msk.msra.mxu1 %vm3437_vm3, %v2455_v47 }
 0x327   : > { %2104 = vmatprep.subr.mxu0 %v2453_v40  ;;  %2147 = vmatprep.subr.mxu1 %v2453_v40 }
 0x328   : > { %2105 = vmatpush3.msra.mxu0 %v2922_v0  ;;  %2148 = vmatpush3.msk.msra.mxu1 %vm3438_vm12, %v2455_v47 }
 0x329   : > { %2106 = vmatprep.subr.mxu0 %v2453_v40  ;;  %2149 = vmatprep.subr.mxu1 %v2453_v40 }
 0x32a   : > { %2107 = vmatpush3.msra.mxu0 %v2948_v35  ;;  %2150 = vmatpush3.msk.msra.mxu1 %vm3439_vm10, %v2455_v47 }
 0x32b   : > { %2108 = vmatprep.subr.mxu0 %v2453_v40  ;;  %2152 = vmatmul.mubr.f32.vlgmr.msra.gmra.mxu1 %v1014_v10 }
 0x32c   : > { %2189 = vmatprep.subr.mxu1 %v2453_v40  ;;  %2109 = vmatpush3.msra.mxu0 %v2976_v53 }
 0x32d   : > { %2190 = vmatpush3.msk.msra.mxu1 %vm2665_vm13, %v2455_v47  ;;  %2110 = vmatprep.subr.mxu0 %v2453_v40  ;;  %vm3444_vm13 = vnez %v3426_v37 }
 0x32e   : > { %2191 = vmatprep.subr.mxu1 %v2453_v40  ;;  %2111 = vmatpush3.msra.mxu0 %v3000_v22 }
 0x32f   : > { %2192 = vmatpush3.msk.msra.mxu1 %vm2675_vm14, %v2455_v47  ;;  %2112 = vmatprep.subr.mxu0 %v2453_v40  ;;  %vm763_vm14 = vcmp.eq.f32.partialorder %v762_v52, %v3046_v6 }
 0x330   : > { %2193 = vmatprep.subr.mxu1 %v2453_v40  ;;  %2113 = vmatpush3.msra.mxu0 %v3002_v42  ;;  %v1783_v56 = vsel %vm763_vm14, 1.0, %v2453_v40 }
 0x331   : > { %2194 = vmatpush3.msk.msra.mxu1 %vm2689_vm15, %v2455_v47  ;;  %2114 = vmatprep.subr.mxu0 %v2453_v40 }
 0x332   : > { %2195 = vmatprep.subr.mxu1 %v2453_v40  ;;  %2115 = vmatpush3.msra.mxu0 %v3023_v32 }
 0x333   : > { %2116 = vmatprep.mubr.msk.f32.mxu0 %vm3434_vm0, %v2453_v40  ;;  %2196 = vmatpush3.msk.msra.mxu1 %vm2696_vm1, %v2455_v47 }
 0x334   : > { %2117 = vmatmul.mubr.f32.vlgmr.msra.gmra.mxu0 %v3071_v13  ;;  %2154 = vmatprep.subr.mxu0 %v2453_v40 }
 0x335   : > { %2197 = vmatprep.subr.mxu1 %v2453_v40  ;;  %2155 = vmatpush3.msra.mxu0 %v1025_v27  ;;  %v3448_v27 = vand.u32 4294901760, %v2976_v53 }
 0x336   : > { %2198 = vmatpush3.msk.msra.mxu1 %vm2712_vm2, %v2455_v47  ;;  %2156 = vmatprep.subr.mxu0 %v2453_v40 }
 0x337   : > { %2199 = vmatprep.subr.mxu1 %v2453_v40  ;;  %2157 = vmatpush3.msra.mxu0 %v1032_v30  ;;  %v3451_v30 = vand.u32 4294901760, %v3023_v32 }
 0x338   : > { %2200 = vmatpush3.msk.msra.mxu1 %vm2816_vm4, %v2455_v47  ;;  %2158 = vmatprep.subr.mxu0 %v2453_v40 }
 0x339   : > { %2201 = vmatprep.subr.mxu1 %v2453_v40  ;;  %2159 = vmatpush3.msra.mxu0 %v1039_v33 }
 0x33a   : > { %2202 = vmatpush3.msk.msra.mxu1 %vm2830_vm5, %v2455_v47  ;;  %2160 = vmatprep.subr.mxu0 %v2453_v40 }
 0x33b   : > { %2203 = vmatprep.subr.mxu1 %v2453_v40  ;;  %2161 = vmatpush3.msra.mxu0 %v1046_v36 }
 0x33c   : > { %2204 = vmatpush3.msk.msra.mxu1 %vm2847_vm6, %v2455_v47  ;;  %2162 = vmatprep.subr.mxu0 %v2453_v40 }
 0x33d   : > { %2205 = vmatprep.subr.mxu1 %v2453_v40  ;;  %2163 = vmatpush3.msra.mxu0 %v1053_v41 }
 0x33e   : > { %2206 = vmatpush3.msk.msra.mxu1 %vm2868_vm7, %v2455_v47  ;;  %2164 = vmatprep.subr.mxu0 %v2453_v40 }
 0x33f   : > { %2207 = vmatprep.subr.mxu1 %v2453_v40  ;;  %2165 = vmatpush3.msra.mxu0 %v3440_v61 }
 0x340   : > { %2208 = vmatpush3.msk.msra.mxu1 %vm2885_vm8, %v2455_v47  ;;  %2166 = vmatprep.subr.mxu0 %v2453_v40 }
 0x341   : > { %2209 = vmatprep.subr.mxu1 %v2453_v40  ;;  %2167 = vmatpush3.msra.mxu0 %v3441_v2 }
 0x342   : > { %2210 = vmatpush3.msk.msra.mxu1 %vm2906_vm9, %v2455_v47  ;;  %2168 = vmatprep.subr.mxu0 %v2453_v40 }
 0x343   : > { %2211 = vmatprep.subr.mxu1 %v2453_v40  ;;  %2169 = vmatpush3.msra.mxu0 %v3442_v18 }
 0x344   : > { %2212 = vmatpush3.msk.msra.mxu1 %vm3435_vm11, %v2455_v47  ;;  %2170 = vmatprep.subr.mxu0 %v2453_v40 }
 0x345   : > { %2213 = vmatprep.subr.mxu1 %v2453_v40  ;;  %2171 = vmatpush3.msra.mxu0 %v3443_v20 }
 0x346   : > { %2214 = vmatpush3.msk.msra.mxu1 %vm3444_vm13, %v2455_v47  ;;  %2172 = vmatprep.subr.mxu0 %v2453_v40 }
 0x347   : > { %2215 = vmatprep.subr.mxu1 %v2453_v40  ;;  %2173 = vmatpush3.msra.mxu0 %v3445_v21 }
 0x348   : > { %2216 = vmatpush3.msk.msra.mxu1 %vm3437_vm3, %v2455_v47  ;;  %2174 = vmatprep.subr.mxu0 %v2453_v40 }
 0x349   : > { %2217 = vmatprep.subr.mxu1 %v2453_v40  ;;  %2175 = vmatpush3.msra.mxu0 %v3446_v24 }
 0x34a   : > { %2218 = vmatpush3.msk.msra.mxu1 %vm3438_vm12, %v2455_v47  ;;  %2176 = vmatprep.subr.mxu0 %v2453_v40 }
 0x34b   : > { %2219 = vmatprep.subr.mxu1 %v2453_v40  ;;  %2177 = vmatpush3.msra.mxu0 %v3447_v26 }
 0x34c   : > { %2220 = vmatpush3.msk.msra.mxu1 %vm3439_vm10, %v2455_v47  ;;  %2221 = vmatprep.mubr.msk.f32.mxu1 %vm3434_vm0, %v2453_v40  ;;  %v3450_v47 = vand.u32 4294901760, %v3002_v42 }
 0x34d   : > { %2178 = vmatprep.subr.mxu0 %v2453_v40  ;;  %2222 = vmatmul.mubr.f32.vlgmr.msra.gmra.mxu1 %v3066_v14 }
 0x34e   : > { %2179 = vmatpush3.msra.mxu0 %v3448_v27  ;;  %2186 = vmatprep.mubr.msk.f32.mxu0 %vm3434_vm0, %v2453_v40 }
 0x34f   : > { %2180 = vmatprep.subr.mxu0 %v2453_v40 }
 0x350   : > { %2181 = vmatpush3.msra.mxu0 %v3449_v28 }
 0x351   : > { %2182 = vmatprep.subr.mxu0 %v2453_v40 }
 0x352   : > { %2183 = vmatpush3.msra.mxu0 %v3450_v47 }
 0x353   : > { %2184 = vmatprep.subr.mxu0 %v2453_v40 }
 0x354   : > { %2185 = vmatpush3.msra.mxu0 %v3451_v30 }
 0x355   : > { %2187 = vmatmul.mubr.f32.vlgmr.msra.gmra.mxu0 %v3066_v14 }
 0x3cb   : > { %v1169_v31 = vpop.f32.mrf.mxu1 }
 0x3cd   : > { %v2083_v33 = vpop.f32.mrf.mxu1 }
 0x3d3   : > { %v1018_v34 = vpop.f32.mrf.mxu0 }
 0x3d4   : > { %v1170_v8 = vadd.f32 %v1169_v31, %v1018_v34 }
 0x3d5   : > { %v2048_v36 = vpop.f32.mrf.mxu0 }
 0x3eb   : > { %v1362_v41 = vpop.f32.mrf.mxu1 }
 0x3ed   : > { %v2153_v54 = vpop.f32.mrf.mxu1 }
 0x3f4   : > { %v1273_v58 = vpop.f32.mrf.mxu0 }
 0x3f5   : > { %v1274_v23 = vadd.f32 %v1273_v58, %v1170_v8 }
 0x3f6   : > { %v2118_v59 = vpop.f32.mrf.mxu0 }
 0x3f7   : > { %v1363_v43 = vadd.f32 %v1362_v41, %v1274_v23 }
 0x40d   : > { %v1568_v7 = vpop.f32.mrf.mxu1 }
 0x40f   : > { %v2223_v19 = vpop.f32.mrf.mxu1 }
 0x415   : > { %v1481_v48 = vpop.f32.mrf.mxu0 }
 0x416   : > { %v1482_v50 = vadd.f32 %v1481_v48, %v1363_v43 }
 0x417   : > { %v2188_v51 = vpop.f32.mrf.mxu0 }
 0x418   : > { %v1569_v0 = vadd.f32 %v1568_v7, %v1482_v50 }
 0x41a   : > { %2313 = vrcp.f32 %v1569_v0 }
 0x427   : > { %v2314_v1 = vpop.eup %2313 }
 0x428   : > { %v1573_v35 = vmul.f32 %v2314_v1, %v1569_v0 }
 0x42a   : > { %v1574_v37 = vsub.f32 2.0, %v1573_v35 }
 0x42c   : > { %v1575_v44 = vmul.f32 %v2314_v1, %v1574_v37 }
 0x42e   : > { %v1576_v45 = vmul.f32 %v3063_v38, %v1575_v44 }
 0x430   : > { %v1577_v53 = vsub.f32 1.0, %v1576_v45 }
 0x432   : > { %v1578_v22 = vmax.f32 %v1577_v53, 0.0 }
 0x434   : > { %2315 = vlog2.f32 %v1578_v22 }
 0x441   : > { %v2316_v42 = vpop.eup %2315 }
 0x442   : > { %v1580_v12 = vmul.f32 0.6931472, %v2316_v42 }
 0x444   : > { %v1581_v32 = vmul.f32 0.6, %v1580_v12 }
 0x446   : > { %v1582_v55 = vmul.f32 1.442695, %v1581_v32 }
 0x448   : > { %2317 = vpow2.f32 %v1582_v55 }
 0x455   : > { %v2318_v17 = vpop.eup %2317 }
 0x456   : > { %v1584_v39 = vmul.f32 %v2318_v17, %v1576_v45 }
 0x458   : > { %v1585_v25 = vmul.f32 2.0, %v1584_v39  ;;  %v1588_v46 = vadd.f32 %v1783_v56, %v1584_v39 }
 0x45a   : > { %v1586_v15 = vmul.f32 %v1783_v56, %v1585_v25  ;;  %v1589_v9 = vadd.f32 1e-06, %v1588_v46 }
 0x45c   : > { %2319 = vrcp.f32 %v1589_v9  ;;  %v1587_v16 = vadd.f32 1e-06, %v1586_v15 }
 0x469   : > { %v2320_v57 = vpop.eup %2319 }
 0x46a   : > { %v1591_v60 = vmul.f32 %v2320_v57, %v1589_v9 }
 0x46c   : > { %v1592_v11 = vsub.f32 2.0, %v1591_v60 }
 0x46e   : > { %v1593_v5 = vmul.f32 %v2320_v57, %v1592_v11 }
 0x470   : > { %v1594_v3 = vmul.f32 %v1593_v5, %v1587_v16 }
 0x472   : > { %v1595_v49 = vsub.f32 1.0, %v1594_v3 }
 0x474   : > { %v1597_v6 = vmul.f32 %v3052_v29, %v1595_v49 }
 0x476   : > { %v1598_v38 = vrot.slane %v1597_v6, 4 }
 0x478   : > { %v1599_v14 = vadd.f32 %v1598_v38, %v1597_v6 }
 0x47a   : > { %v1600_v13 = vrot.slane %v1599_v14, 2 }
 0x47c   : > { %v1601_v40 = vadd.f32 %v1600_v13, %v1599_v14 }
 0x47e   : > { %v1602_v10 = vrot.slane %v1601_v40, 1 }
 0x480   : > { %v1603_v63 = vadd.f32 %v1602_v10, %v1601_v40 }
 0x482   : > { %v1604_v61 = vadd.f32 %v1603_v63, %v1596_v4 }
 0x484   : > { %1605 = vst [vmem:[%s2561_s21] sm:$0x1] %v1604_v61 }
 0x485 PF: > { %s3394_s8 = sshll.u32 %s2431_s16, 4  ;;  %s1632_s20 = sshll.u32 %s2561_s21, 4  ;;  %s1633_s20 = int_to_ptr.vmem [resolvable:$true] %s1632_s20 }
 0x486   : > { %s1630_s11 = scalar_lea.hbm %s3368_s2, %s3394_s8  ;;  %s1616_s27 = scalar_lea.sflag [#allocation3], %s2548_s29 }
 0x487   : > { %s2321_s30 = scalar_lea.vmem %s1633_s20, 16  ;;  %s2456_s15 = smov [#allocation2]  }
 0x488   : > { %p2322_p1 = scmp.ne.s32.totalorder %s1633_s20, %s2321_s30  ;;  %s2325_s4 = sshll.u32 %s2456_s15, 4  ;;  %s2326_s4 = int_to_ptr.vmem [resolvable:$false] %s2325_s4 }
 0x489   : > { %s2327_s5 = scalar_lea.vmem %s2326_s4, 32  ;;  %p2328_p5 = scmp.lt.s32.totalorder %s1633_s20, %s2326_s4 }
 0x48a   : > { %p2323_p2 = pnand %p2322_p1, %p2527_p3  ;;  %p2329_p6 = scmp.lt.s32.totalorder %s2327_s5, %s2321_s30 }
 0x48c   : > { %p2324_p4 = pneg %p2323_p2  ;;  %p2330_p7 = por %p2329_p6, %p2328_p5 }
 0x48e   : > { %p2331_p8 = pnand %p2330_p7, %p2324_p4 }
 0x490   : > { %2334 = shalt.err (!%p2331_p8)
}
 0x491   : > { %s2335_s6 = scalar_lea.hbm %s1630_s11, 16  ;;  %s2339_s9 = scalar_lea.hbm %s3368_s2, 32 }
 0x492   : > { %p2336_p10 = scmp.ne.s32.totalorder %s1630_s11, %s2335_s6  ;;  %p2340_p13 = scmp.lt.s32.totalorder %s1630_s11, %s3368_s2 }
 0x493   : > { %p2341_p0 = scmp.lt.s32.totalorder %s2339_s9, %s2335_s6 }
 0x494   : > { %p2337_p11 = pnand %p2336_p10, %p2527_p3 }
 0x495   : > { %p2342_p1 = por %p2341_p0, %p2340_p13 }
 0x496   : > { %p2338_p12 = pneg %p2337_p11 }
 0x498   : > { %p2343_p2 = pnand %p2342_p1, %p2338_p12 }
 0x49a   : > { %2346 = shalt.err (!%p2343_p2)
}
 0x49b   : > { %2224 = dma.vmem_to_hbm [thread:$0]  (%p2527_p3), %s1633_s20, 16, %s1630_s11, %s1616_s27  }
 0x49c   : > { %s3452_s30 = sshll.u32 %s2431_s16, 4  ;;  %s1645_s21 = sshll.u32 %s2564_s26, 4  ;;  %s1646_s21 = int_to_ptr.vmem [resolvable:$true] %s1645_s21 }
 0x49d   : > { %s1643_s5 = scalar_lea.hbm %s3369_s3, %s3452_s30  ;;  %s1620_s8 = scalar_lea.sflag [#allocation5], %s2548_s29 }
 0x49e   : > { %s2347_s7 = scalar_lea.vmem %s1646_s21, 16  ;;  %s2457_s6 = smov [#allocation4]  }
 0x49f   : > { %p2348_p4 = scmp.ne.s32.totalorder %s1646_s21, %s2347_s7  ;;  %s2351_s9 = sshll.u32 %s2457_s6, 4  ;;  %s2352_s9 = int_to_ptr.vmem [resolvable:$false] %s2351_s9 }
 0x4a0   : > { %s2353_s10 = scalar_lea.vmem %s2352_s9, 32  ;;  %p2354_p7 = scmp.lt.s32.totalorder %s1646_s21, %s2352_s9 }
 0x4a1   : > { %p2349_p5 = pnand %p2348_p4, %p2527_p3  ;;  %p2355_p8 = scmp.lt.s32.totalorder %s2353_s10, %s2347_s7 }
 0x4a3   : > { %p2350_p6 = pneg %p2349_p5  ;;  %p2356_p10 = por %p2355_p8, %p2354_p7 }
 0x4a5   : > { %p2357_p11 = pnand %p2356_p10, %p2350_p6 }
 0x4a7   : > { %2360 = shalt.err (!%p2357_p11)
}
 0x4a8   : > { %s2361_s16 = scalar_lea.hbm %s1643_s5, 16  ;;  %s2365_s11 = scalar_lea.hbm %s3369_s3, 32 }
 0x4a9   : > { %p2362_p12 = scmp.ne.s32.totalorder %s1643_s5, %s2361_s16  ;;  %p2366_p1 = scmp.lt.s32.totalorder %s1643_s5, %s3369_s3 }
 0x4aa   : > { %p2367_p2 = scmp.lt.s32.totalorder %s2365_s11, %s2361_s16 }
 0x4ab   : > { %p2363_p13 = pnand %p2362_p12, %p2527_p3 }
 0x4ac   : > { %p2368_p4 = por %p2367_p2, %p2366_p1 }
 0x4ad   : > { %p2364_p0 = pneg %p2363_p13 }
 0x4af   : > { %p2369_p5 = pnand %p2368_p4, %p2364_p0 }
 0x4b1   : > { %2372 = shalt.err (!%p2369_p5)
}
 0x4b2   : > { %2225 = dma.vmem_to_hbm [thread:$0]  (%p2527_p3), %s1646_s21, 16, %s1643_s5, %s1620_s8  }
 0x4b3 PF: > { %p2235_p6 = scmp.ge.s32.totalorder %s2443_s19, 2  ;;  %s1657_s30 = sand.u32 1, %s2415_s12  }
 0x4b4   : > { %s1658_s15 = scalar_lea.sflag [#allocation3], %s1657_s30 }
 0x4b5   : > { %p2229_p7 = pnand %p2235_p6, %p2537_p9 }
 0x4b7   : > { %p2230_p8 = pneg %p2229_p7 }
 0x4b9   : > { %2406 = dma.done.wait (%p2230_p8), %s1658_s15, 16  }
 0x4ba   : > { %2408 = vsyncadd (%p2230_p8), %s1658_s15, 4294967280  ;;  %s1666_s4 = scalar_lea.sflag [#allocation5], %s1657_s30 }
 0x4bb   : > { %2410 = dma.done.wait (%p2230_p8), %s1666_s4, 16  }
 0x4bc   : > { %2412 = vsyncadd (%p2230_p8), %s1666_s4, 4294967280  ;;  %s20_s19 = sadd.s32 1, %s2443_s19   ;;  %s3453_s12 = smov %s2419_s13 }
 0x4bd   : > { %p17_p10 = scmp.ge.s32.totalorder %s20_s19, 6   ;;  %s3454_s13 = smov %s2423_s14 }
 0x4be   : > { %s3455_s14 = smov %s2545_s28  ;;  %s3456_s15 = smov %s2435_s17 }
 0x4bf   : > { %s3457_s16 = smov %s2439_s18  ;;  %s3458_s17 = smov %s3461_s22 }
 0x4c0   : > { %s3459_s18 = smov %s3465_s23  ;;  %19 = sbr.rel (!%p17_p10) target bundleno = 7 (0x7), region = 91 }
 0x4c5   :  { %1670 = vsyncpa [#allocation3], 1 }
 0x4c6   :  { %1672 = vsyncpa [#allocation3 + $0x1], 1 }
 0x4c7   :  { %1673 = vsyncpa [#allocation5], 1 }
 0x4c8   :  { %1675 = vsyncpa [#allocation5 + $0x1], 1 }

</bundles_post_ra>
